<compile_context>
chip_gen: v7x
topology: tpu7x:2x2x1
jax: 0.10.0
libtpu: 0.0.40
codegen_flags: <defaults>
</compile_context>

<pallas_src>
import functools
import math

import jax
import jax.numpy as jnp
from jax import lax
from jax.experimental import pallas as pl
from jax.experimental.pallas import tpu as pltpu

LANE = 128  # TPU lane width; every channel dim is zero-padded to this.


# ------------------------------ fused kernel ------------------------------- #

def _fused_kernel(xt_ref, w1_ref, b1_ref, w2_ref, b2_ref,
                  cw1_ref, cb1_ref, cw2_ref, cb2_ref,
                  mel_ref, melp_ref, *, T, K):
    PAD = K // 2

    # ---- front end: one block-diagonal dot + lane-masked activation --------
    # xt lanes [0,128) hold the encoder input, lanes [128,256) the tts input;
    # w1 is block-diagonal, so a single dot computes both pre-activations.
    h = jnp.dot(xt_ref[...], w1_ref[...],
                preferred_element_type=jnp.float32) + b1_ref[...]
    lane = lax.broadcasted_iota(jnp.int32, (T, 2 * LANE), 1)
    act = jnp.where(lane < LANE, jnp.tanh(h), jnp.maximum(h, 0.0))

    # ---- decoder projection: one (T,256)@(256,128) dot ---------------------
    mel = jnp.dot(act, w2_ref[...],
                  preferred_element_type=jnp.float32) + b2_ref[...]
    mel_ref[...] = mel.astype(mel_ref.dtype)

    # ---- postnet: two K-tap same-padded 1-D convs over time ----------------
    # Shifted tap operands come from a sublane roll of the in-vreg value plus a
    # mask that zeroes the wrapped boundary rows (same-padding), so there is no
    # padded VMEM scratch, no margin zero-fill and no unaligned ref slices.
    row = lax.broadcasted_iota(jnp.int32, (T, LANE), 0)

    def conv_same(x, w_ref, b_ref):
        acc = jnp.zeros((T, LANE), jnp.float32)
        for k in range(K):
            s = k - PAD                               # tap k reads x[t + s]
            if s == 0:
                tap = x
            else:
                shifted = pltpu.roll(x, shift=(-s) % T, axis=0)
                valid = (row >= PAD - k) & (row < T + PAD - k)
                tap = jnp.where(valid, shifted, 0.0)
            acc += jnp.dot(tap, w_ref[k], preferred_element_type=jnp.float32)
        return acc + b_ref[...]

    hp = jnp.tanh(conv_same(mel, cw1_ref, cb1_ref))
    # Residual: re-read mel from the output block instead of keeping the value
    # live across both convs (bounds vreg live range / avoids spills).
    out = conv_same(hp, cw2_ref, cb2_ref) + mel_ref[...]
    melp_ref[...] = out.astype(melp_ref.dtype)


def _build_fused_call(B, T, K):
    def vrow():
        return pl.BlockSpec((1, LANE), lambda b: (0, 0))

    return pl.pallas_call(
        functools.partial(_fused_kernel, T=T, K=K),
        out_shape=(jax.ShapeDtypeStruct((B * T, LANE), jnp.float32),
                   jax.ShapeDtypeStruct((B * T, LANE), jnp.float32)),
        grid=(B,),
        in_specs=[
            pl.BlockSpec((T, 2 * LANE), lambda b: (b, 0)),          # fused inputs
            pl.BlockSpec((2 * LANE, 2 * LANE), lambda b: (0, 0)),   # w1 (block-diag)
            pl.BlockSpec((1, 2 * LANE), lambda b: (0, 0)),          # b1
            pl.BlockSpec((2 * LANE, LANE), lambda b: (0, 0)),       # w2 (projection)
            vrow(),                                                 # b2
            pl.BlockSpec((K, LANE, LANE), lambda b: (0, 0, 0)),     # postnet conv1 w
            vrow(),                                                 # postnet conv1 b
            pl.BlockSpec((K, LANE, LANE), lambda b: (0, 0, 0)),     # postnet conv2 w
            vrow(),                                                 # postnet conv2 b
        ],
        out_specs=(pl.BlockSpec((T, LANE), lambda b: (b, 0)),
                   pl.BlockSpec((T, LANE), lambda b: (b, 0))),
        compiler_params=pltpu.CompilerParams(
            dimension_semantics=("parallel",),
            vmem_limit_bytes=32 * 1024 * 1024),
    )


# ------------------------- model params & forward -------------------------- #

def init_params(key, d_in, hidden, n_mels, postnet_ch, K):
    """Logical weights plus fused, 128-lane-padded containers for the kernel.
    Zero padding keeps the live-lane math identical; dead lanes stay exactly 0
    through tanh/relu because the padded biases are zero there."""
    ks = jax.random.split(key, 11)

    def u(k, shape, fan_in):
        lim = 1.0 / math.sqrt(fan_in)
        return jax.random.uniform(k, shape, jnp.float32, -lim, lim)

    logical = dict(
        enc_w=u(ks[0], (d_in, hidden), d_in),
        enc_b=u(ks[1], (hidden,), d_in),
        pre_w=u(ks[2], (n_mels, hidden), n_mels),
        pre_b=u(ks[3], (hidden,), n_mels),
        proj_w1=u(ks[4], (hidden, n_mels), 2 * hidden),
        proj_w2=u(ks[5], (hidden, n_mels), 2 * hidden),
        proj_b=u(ks[6], (n_mels,), 2 * hidden),
        post_w1=u(ks[7], (K, n_mels, postnet_ch), K * n_mels),
        post_b1=u(ks[8], (postnet_ch,), K * n_mels),
        post_w2=u(ks[9], (K, postnet_ch, n_mels), K * postnet_ch),
        post_b2=u(ks[10], (n_mels,), K * postnet_ch),
    )

    w1 = (jnp.zeros((2 * LANE, 2 * LANE), jnp.float32)
          .at[:d_in, :hidden].set(logical["enc_w"])
          .at[LANE:LANE + n_mels, LANE:LANE + hidden].set(logical["pre_w"]))
    b1 = (jnp.zeros((1, 2 * LANE), jnp.float32)
          .at[0, :hidden].set(logical["enc_b"])
          .at[0, LANE:LANE + hidden].set(logical["pre_b"]))
    w2 = (jnp.zeros((2 * LANE, LANE), jnp.float32)
          .at[:hidden, :n_mels].set(logical["proj_w1"])
          .at[LANE:LANE + hidden, :n_mels].set(logical["proj_w2"]))
    b2 = jnp.zeros((1, LANE), jnp.float32).at[0, :n_mels].set(logical["proj_b"])
    cw1 = (jnp.zeros((K, LANE, LANE), jnp.float32)
           .at[:, :n_mels, :postnet_ch].set(logical["post_w1"]))
    cb1 = jnp.zeros((1, LANE), jnp.float32).at[0, :postnet_ch].set(logical["post_b1"])
    cw2 = (jnp.zeros((K, LANE, LANE), jnp.float32)
           .at[:, :postnet_ch, :n_mels].set(logical["post_w2"]))
    cb2 = jnp.zeros((1, LANE), jnp.float32).at[0, :n_mels].set(logical["post_b2"])

    return dict(logical=logical, w1=w1, b1=b1, w2=w2, b2=b2,
                cw1=cw1, cb1=cb1, cw2=cw2, cb2=cb2)


@jax.jit
def parrotron_no_asr_forward(params, inputs, tts_inputs, targets):
    """Mirrors Parrotron_No_ASR.forward: returns (mel_postnet, mel, None)."""
    del targets  # only consumed by the training loss in the original code
    B, T, d_in = inputs.shape
    n_mels = tts_inputs.shape[-1]
    K = params["cw1"].shape[0]
    assert T % 8 == 0, "time dim must be a multiple of 8 (sublane tiling)"
    # TODO(synk): pad + in-kernel mask for ragged T (T % 8 != 0) if ever needed.

    # One fused lane-padded input slab: encoder input in lanes [0,128),
    # teacher-forced mels in lanes [128,256)  (tiny one-time host copies).
    xt = jnp.zeros((B * T, 2 * LANE), jnp.float32)
    xt = xt.at[:, :d_in].set(inputs.reshape(B * T, d_in).astype(jnp.float32))
    xt = xt.at[:, LANE:LANE + n_mels].set(
        tts_inputs.reshape(B * T, n_mels).astype(jnp.float32))

    mel_pad, melp_pad = _build_fused_call(B, T, K)(
        xt, params["w1"], params["b1"], params["w2"], params["b2"],
        params["cw1"], params["cb1"], params["cw2"], params["cb2"])

    mel = mel_pad[:, :n_mels].reshape(B, T, n_mels)
    mel_postnet = melp_pad[:, :n_mels].reshape(B, T, n_mels)
    txt_outputs = None
    return mel_postnet, mel, txt_outputs


# ------------------------------ pure-JAX ref -------------------------------- #

def _ref_forward(params, inputs, tts_inputs):
    """Independent XLA reference on the *logical* (unpadded) weights."""
    lg = params["logical"]
    T = inputs.shape[1]

    enc = jnp.tanh(inputs @ lg["enc_w"] + lg["enc_b"])
    pre = jax.nn.relu(tts_inputs @ lg["pre_w"] + lg["pre_b"])
    mel = enc @ lg["proj_w1"] + pre @ lg["proj_w2"] + lg["proj_b"]

    def conv1d_same(x, w, b):
        Kk = w.shape[0]
        pad = Kk // 2
        xp = jnp.pad(x, ((0, 0), (pad, pad), (0, 0)))
        return sum(jnp.einsum("btc,cd->btd", xp[:, k:k + T, :], w[k])
                   for k in range(Kk)) + b

    h = jnp.tanh(conv1d_same(mel, lg["post_w1"], lg["post_b1"]))
    melp = mel + conv1d_same(h, lg["post_w2"], lg["post_b2"])
    return melp, mel


# ----------------------------------- main ----------------------------------- #

if __name__ == "__main__":
    B, T, D_IN, HIDDEN, N_MELS, POSTNET_CH, K = 2, 16, 32, 32, 16, 32, 5

    key = jax.random.PRNGKey(0)
    k_in, k_tts, k_tgt, k_par = jax.random.split(key, 4)

    inputs = jax.random.normal(k_in, (B, T, D_IN), jnp.float32)         # source spectrogram
    tts_inputs = jax.random.normal(k_tts, (B, T, N_MELS), jnp.float32)  # teacher-forced mels
    targets = jax.random.normal(k_tgt, (B, T, N_MELS), jnp.float32)     # unused in forward

    params = init_params(k_par, D_IN, HIDDEN, N_MELS, POSTNET_CH, K)

    mel_postnet, mel, txt = parrotron_no_asr_forward(params, inputs, tts_inputs, targets)
    jax.block_until_ready((mel_postnet, mel))

    assert mel_postnet.shape == (B, T, N_MELS)
    assert mel.shape == (B, T, N_MELS)
    assert txt is None

    ref_melp, ref_mel = _ref_forward(params, inputs, tts_inputs)
    assert jnp.allclose(mel, ref_mel, rtol=1e-4, atol=1e-4), "mel mismatch vs reference"
    assert jnp.allclose(mel_postnet, ref_melp, rtol=1e-4, atol=1e-4), "postnet mismatch vs reference"

    print("KERNEL_OK")
</pallas_src>

<mosaic_0001>
module attributes {stable_mosaic.version = 11 : i64} {
  func.func @_fused_kernel(%arg0: i32, %arg1: memref<16x256xf32, #tpu.memory_space<vmem>>, %arg2: memref<256x256xf32, #tpu.memory_space<vmem>>, %arg3: memref<1x256xf32, #tpu.memory_space<vmem>>, %arg4: memref<256x128xf32, #tpu.memory_space<vmem>>, %arg5: memref<1x128xf32, #tpu.memory_space<vmem>>, %arg6: memref<5x128x128xf32, #tpu.memory_space<vmem>>, %arg7: memref<1x128xf32, #tpu.memory_space<vmem>>, %arg8: memref<5x128x128xf32, #tpu.memory_space<vmem>>, %arg9: memref<1x128xf32, #tpu.memory_space<vmem>>, %arg10: memref<16x128xf32, #tpu.memory_space<vmem>>, %arg11: memref<16x128xf32, #tpu.memory_space<vmem>>) attributes {dimension_semantics = [#tpu.dimension_semantics<parallel>], iteration_bounds = array<i64: 2>, scalar_prefetch = 0 : i64, scratch_operands = 0 : i64, tpu.core_type = #tpu.core_type<tc>, window_params = [{transform_indices = @transform_0, window_bounds = array<i64: 16, 256>}, {pipeline_mode = #tpu.pipeline_mode<synchronous>, transform_indices = @transform_1, window_bounds = array<i64: 256, 256>}, {pipeline_mode = #tpu.pipeline_mode<synchronous>, transform_indices = @transform_2, window_bounds = array<i64: 1, 256>}, {pipeline_mode = #tpu.pipeline_mode<synchronous>, transform_indices = @transform_3, window_bounds = array<i64: 256, 128>}, {pipeline_mode = #tpu.pipeline_mode<synchronous>, transform_indices = @transform_4, window_bounds = array<i64: 1, 128>}, {pipeline_mode = #tpu.pipeline_mode<synchronous>, transform_indices = @transform_5, window_bounds = array<i64: 5, 128, 128>}, {pipeline_mode = #tpu.pipeline_mode<synchronous>, transform_indices = @transform_6, window_bounds = array<i64: 1, 128>}, {pipeline_mode = #tpu.pipeline_mode<synchronous>, transform_indices = @transform_7, window_bounds = array<i64: 5, 128, 128>}, {pipeline_mode = #tpu.pipeline_mode<synchronous>, transform_indices = @transform_8, window_bounds = array<i64: 1, 128>}, {transform_indices = @transform_9, window_bounds = array<i64: 16, 128>}, {transform_indices = @transform_10, window_bounds = array<i64: 16, 128>}]} {
    %c0 = arith.constant 0 : index
    %c0_0 = arith.constant 0 : index
    %0 = vector.load %arg1[%c0, %c0_0] : memref<16x256xf32, #tpu.memory_space<vmem>>, vector<16x256xf32>
    %c0_1 = arith.constant 0 : index
    %c0_2 = arith.constant 0 : index
    %1 = vector.load %arg2[%c0_1, %c0_2] : memref<256x256xf32, #tpu.memory_space<vmem>>, vector<256x256xf32>
    %cst = arith.constant dense<0.000000e+00> : vector<16x256xf32>
    %2 = tpu.matmul %0, %1, %cst {dimension_numbers = #tpu.dot_dimension_numbers<[1], [0], [0], [1], [0, 0, 1, 1], [], []>} : vector<16x256xf32>, vector<256x256xf32>, vector<16x256xf32> -> vector<16x256xf32>
    %c0_3 = arith.constant 0 : index
    %c0_4 = arith.constant 0 : index
    %3 = vector.load %arg3[%c0_3, %c0_4] : memref<1x256xf32, #tpu.memory_space<vmem>>, vector<1x256xf32>
    %4 = vector.broadcast %3 : vector<1x256xf32> to vector<16x256xf32>
    %5 = arith.addf %2, %4 : vector<16x256xf32>
    %6 = tpu.iota {dimensions = array<i32: 1>} : vector<16x256xi32>
    %c128_i32 = arith.constant 128 : i32
    %7 = vector.broadcast %c128_i32 : i32 to vector<16x256xi32>
    %8 = arith.cmpi slt, %6, %7 : vector<16x256xi32>
    %9 = math.tanh %5 : vector<16x256xf32>
    %cst_5 = arith.constant 0.000000e+00 : f32
    %10 = vector.broadcast %cst_5 : f32 to vector<16x256xf32>
    %11 = arith.maximumf %5, %10 : vector<16x256xf32>
    %12 = arith.select %8, %9, %11 : vector<16x256xi1>, vector<16x256xf32>
    %c0_6 = arith.constant 0 : index
    %c0_7 = arith.constant 0 : index
    %13 = vector.load %arg4[%c0_6, %c0_7] : memref<256x128xf32, #tpu.memory_space<vmem>>, vector<256x128xf32>
    %cst_8 = arith.constant dense<0.000000e+00> : vector<16x128xf32>
    %14 = tpu.matmul %12, %13, %cst_8 {dimension_numbers = #tpu.dot_dimension_numbers<[1], [0], [0], [1], [0, 0, 1, 1], [], []>} : vector<16x256xf32>, vector<256x128xf32>, vector<16x128xf32> -> vector<16x128xf32>
    %c0_9 = arith.constant 0 : index
    %c0_10 = arith.constant 0 : index
    %15 = vector.load %arg5[%c0_9, %c0_10] : memref<1x128xf32, #tpu.memory_space<vmem>>, vector<1x128xf32>
    %16 = vector.broadcast %15 : vector<1x128xf32> to vector<16x128xf32>
    %17 = arith.addf %14, %16 : vector<16x128xf32>
    %c0_11 = arith.constant 0 : index
    %c0_12 = arith.constant 0 : index
    %18 = vector.load %arg10[%c0_11, %c0_12] : memref<16x128xf32, #tpu.memory_space<vmem>>, vector<16x128xf32>
    tpu.vector_store %arg10[%c0_11, %c0_12], %17 {strides = array<i32>} : memref<16x128xf32, #tpu.memory_space<vmem>>, vector<16x128xf32>,
    %19 = tpu.iota {dimensions = array<i32: 0>} : vector<16x128xi32>
    %cst_13 = arith.constant 0.000000e+00 : f32
    %20 = vector.broadcast %cst_13 : f32 to vector<16x128xf32>
    %c2_i32 = arith.constant 2 : i32
    %21 = tpu.dynamic_rotate %17 by %c2_i32 dim 0 : vector<16x128xf32>, i32 -> vector<16x128xf32>
    %c2_i32_14 = arith.constant 2 : i32
    %22 = vector.broadcast %c2_i32_14 : i32 to vector<16x128xi32>
    %23 = arith.cmpi sge, %19, %22 : vector<16x128xi32>
    %c18_i32 = arith.constant 18 : i32
    %24 = vector.broadcast %c18_i32 : i32 to vector<16x128xi32>
    %25 = arith.cmpi slt, %19, %24 : vector<16x128xi32>
    %26 = arith.andi %23, %25 : vector<16x128xi1>
    %cst_15 = arith.constant 0.000000e+00 : f32
    %27 = vector.broadcast %cst_15 : f32 to vector<16x128xf32>
    %28 = arith.select %26, %21, %27 : vector<16x128xi1>, vector<16x128xf32>
    %c0_16 = arith.constant 0 : index
    %c0_17 = arith.constant 0 : index
    %c0_18 = arith.constant 0 : index
    %29 = vector.load %arg6[%c0_16, %c0_17, %c0_18] : memref<5x128x128xf32, #tpu.memory_space<vmem>>, vector<1x128x128xf32>
    %30 = vector.shape_cast %29 : vector<1x128x128xf32> to vector<128x128xf32>
    %cst_19 = arith.constant dense<0.000000e+00> : vector<16x128xf32>
    %31 = tpu.matmul %28, %30, %cst_19 {dimension_numbers = #tpu.dot_dimension_numbers<[1], [0], [0], [1], [0, 0, 1, 1], [], []>} : vector<16x128xf32>, vector<128x128xf32>, vector<16x128xf32> -> vector<16x128xf32>
    %32 = arith.addf %20, %31 : vector<16x128xf32>
    %c1_i32 = arith.constant 1 : i32
    %33 = tpu.dynamic_rotate %17 by %c1_i32 dim 0 : vector<16x128xf32>, i32 -> vector<16x128xf32>
    %c1_i32_20 = arith.constant 1 : i32
    %34 = vector.broadcast %c1_i32_20 : i32 to vector<16x128xi32>
    %35 = arith.cmpi sge, %19, %34 : vector<16x128xi32>
    %c17_i32 = arith.constant 17 : i32
    %36 = vector.broadcast %c17_i32 : i32 to vector<16x128xi32>
    %37 = arith.cmpi slt, %19, %36 : vector<16x128xi32>
    %38 = arith.andi %35, %37 : vector<16x128xi1>
    %cst_21 = arith.constant 0.000000e+00 : f32
    %39 = vector.broadcast %cst_21 : f32 to vector<16x128xf32>
    %40 = arith.select %38, %33, %39 : vector<16x128xi1>, vector<16x128xf32>
    %c1 = arith.constant 1 : index
    %c0_22 = arith.constant 0 : index
    %c0_23 = arith.constant 0 : index
    %41 = vector.load %arg6[%c1, %c0_22, %c0_23] : memref<5x128x128xf32, #tpu.memory_space<vmem>>, vector<1x128x128xf32>
    %42 = vector.shape_cast %41 : vector<1x128x128xf32> to vector<128x128xf32>
    %cst_24 = arith.constant dense<0.000000e+00> : vector<16x128xf32>
    %43 = tpu.matmul %40, %42, %cst_24 {dimension_numbers = #tpu.dot_dimension_numbers<[1], [0], [0], [1], [0, 0, 1, 1], [], []>} : vector<16x128xf32>, vector<128x128xf32>, vector<16x128xf32> -> vector<16x128xf32>
    %44 = arith.addf %32, %43 : vector<16x128xf32>
    %c2 = arith.constant 2 : index
    %c0_25 = arith.constant 0 : index
    %c0_26 = arith.constant 0 : index
    %45 = vector.load %arg6[%c2, %c0_25, %c0_26] : memref<5x128x128xf32, #tpu.memory_space<vmem>>, vector<1x128x128xf32>
    %46 = vector.shape_cast %45 : vector<1x128x128xf32> to vector<128x128xf32>
    %cst_27 = arith.constant dense<0.000000e+00> : vector<16x128xf32>
    %47 = tpu.matmul %17, %46, %cst_27 {dimension_numbers = #tpu.dot_dimension_numbers<[1], [0], [0], [1], [0, 0, 1, 1], [], []>} : vector<16x128xf32>, vector<128x128xf32>, vector<16x128xf32> -> vector<16x128xf32>
    %48 = arith.addf %44, %47 : vector<16x128xf32>
    %c15_i32 = arith.constant 15 : i32
    %49 = tpu.dynamic_rotate %17 by %c15_i32 dim 0 : vector<16x128xf32>, i32 -> vector<16x128xf32>
    %c-1_i32 = arith.constant -1 : i32
    %50 = vector.broadcast %c-1_i32 : i32 to vector<16x128xi32>
    %51 = arith.cmpi sge, %19, %50 : vector<16x128xi32>
    %c15_i32_28 = arith.constant 15 : i32
    %52 = vector.broadcast %c15_i32_28 : i32 to vector<16x128xi32>
    %53 = arith.cmpi slt, %19, %52 : vector<16x128xi32>
    %54 = arith.andi %51, %53 : vector<16x128xi1>
    %cst_29 = arith.constant 0.000000e+00 : f32
    %55 = vector.broadcast %cst_29 : f32 to vector<16x128xf32>
    %56 = arith.select %54, %49, %55 : vector<16x128xi1>, vector<16x128xf32>
    %c3 = arith.constant 3 : index
    %c0_30 = arith.constant 0 : index
    %c0_31 = arith.constant 0 : index
    %57 = vector.load %arg6[%c3, %c0_30, %c0_31] : memref<5x128x128xf32, #tpu.memory_space<vmem>>, vector<1x128x128xf32>
    %58 = vector.shape_cast %57 : vector<1x128x128xf32> to vector<128x128xf32>
    %cst_32 = arith.constant dense<0.000000e+00> : vector<16x128xf32>
    %59 = tpu.matmul %56, %58, %cst_32 {dimension_numbers = #tpu.dot_dimension_numbers<[1], [0], [0], [1], [0, 0, 1, 1], [], []>} : vector<16x128xf32>, vector<128x128xf32>, vector<16x128xf32> -> vector<16x128xf32>
    %60 = arith.addf %48, %59 : vector<16x128xf32>
    %c14_i32 = arith.constant 14 : i32
    %61 = tpu.dynamic_rotate %17 by %c14_i32 dim 0 : vector<16x128xf32>, i32 -> vector<16x128xf32>
    %c-2_i32 = arith.constant -2 : i32
    %62 = vector.broadcast %c-2_i32 : i32 to vector<16x128xi32>
    %63 = arith.cmpi sge, %19, %62 : vector<16x128xi32>
    %c14_i32_33 = arith.constant 14 : i32
    %64 = vector.broadcast %c14_i32_33 : i32 to vector<16x128xi32>
    %65 = arith.cmpi slt, %19, %64 : vector<16x128xi32>
    %66 = arith.andi %63, %65 : vector<16x128xi1>
    %cst_34 = arith.constant 0.000000e+00 : f32
    %67 = vector.broadcast %cst_34 : f32 to vector<16x128xf32>
    %68 = arith.select %66, %61, %67 : vector<16x128xi1>, vector<16x128xf32>
    %c4 = arith.constant 4 : index
    %c0_35 = arith.constant 0 : index
    %c0_36 = arith.constant 0 : index
    %69 = vector.load %arg6[%c4, %c0_35, %c0_36] : memref<5x128x128xf32, #tpu.memory_space<vmem>>, vector<1x128x128xf32>
    %70 = vector.shape_cast %69 : vector<1x128x128xf32> to vector<128x128xf32>
    %cst_37 = arith.constant dense<0.000000e+00> : vector<16x128xf32>
    %71 = tpu.matmul %68, %70, %cst_37 {dimension_numbers = #tpu.dot_dimension_numbers<[1], [0], [0], [1], [0, 0, 1, 1], [], []>} : vector<16x128xf32>, vector<128x128xf32>, vector<16x128xf32> -> vector<16x128xf32>
    %72 = arith.addf %60, %71 : vector<16x128xf32>
    %c0_38 = arith.constant 0 : index
    %c0_39 = arith.constant 0 : index
    %73 = vector.load %arg7[%c0_38, %c0_39] : memref<1x128xf32, #tpu.memory_space<vmem>>, vector<1x128xf32>
    %74 = vector.broadcast %73 : vector<1x128xf32> to vector<16x128xf32>
    %75 = arith.addf %72, %74 : vector<16x128xf32>
    %76 = math.tanh %75 : vector<16x128xf32>
    %cst_40 = arith.constant 0.000000e+00 : f32
    %77 = vector.broadcast %cst_40 : f32 to vector<16x128xf32>
    %c2_i32_41 = arith.constant 2 : i32
    %78 = tpu.dynamic_rotate %76 by %c2_i32_41 dim 0 : vector<16x128xf32>, i32 -> vector<16x128xf32>
    %c2_i32_42 = arith.constant 2 : i32
    %79 = vector.broadcast %c2_i32_42 : i32 to vector<16x128xi32>
    %80 = arith.cmpi sge, %19, %79 : vector<16x128xi32>
    %c18_i32_43 = arith.constant 18 : i32
    %81 = vector.broadcast %c18_i32_43 : i32 to vector<16x128xi32>
    %82 = arith.cmpi slt, %19, %81 : vector<16x128xi32>
    %83 = arith.andi %80, %82 : vector<16x128xi1>
    %cst_44 = arith.constant 0.000000e+00 : f32
    %84 = vector.broadcast %cst_44 : f32 to vector<16x128xf32>
    %85 = arith.select %83, %78, %84 : vector<16x128xi1>, vector<16x128xf32>
    %c0_45 = arith.constant 0 : index
    %c0_46 = arith.constant 0 : index
    %c0_47 = arith.constant 0 : index
    %86 = vector.load %arg8[%c0_45, %c0_46, %c0_47] : memref<5x128x128xf32, #tpu.memory_space<vmem>>, vector<1x128x128xf32>
    %87 = vector.shape_cast %86 : vector<1x128x128xf32> to vector<128x128xf32>
    %cst_48 = arith.constant dense<0.000000e+00> : vector<16x128xf32>
    %88 = tpu.matmul %85, %87, %cst_48 {dimension_numbers = #tpu.dot_dimension_numbers<[1], [0], [0], [1], [0, 0, 1, 1], [], []>} : vector<16x128xf32>, vector<128x128xf32>, vector<16x128xf32> -> vector<16x128xf32>
    %89 = arith.addf %77, %88 : vector<16x128xf32>
    %c1_i32_49 = arith.constant 1 : i32
    %90 = tpu.dynamic_rotate %76 by %c1_i32_49 dim 0 : vector<16x128xf32>, i32 -> vector<16x128xf32>
    %c1_i32_50 = arith.constant 1 : i32
    %91 = vector.broadcast %c1_i32_50 : i32 to vector<16x128xi32>
    %92 = arith.cmpi sge, %19, %91 : vector<16x128xi32>
    %c17_i32_51 = arith.constant 17 : i32
    %93 = vector.broadcast %c17_i32_51 : i32 to vector<16x128xi32>
    %94 = arith.cmpi slt, %19, %93 : vector<16x128xi32>
    %95 = arith.andi %92, %94 : vector<16x128xi1>
    %cst_52 = arith.constant 0.000000e+00 : f32
    %96 = vector.broadcast %cst_52 : f32 to vector<16x128xf32>
    %97 = arith.select %95, %90, %96 : vector<16x128xi1>, vector<16x128xf32>
    %c1_53 = arith.constant 1 : index
    %c0_54 = arith.constant 0 : index
    %c0_55 = arith.constant 0 : index
    %98 = vector.load %arg8[%c1_53, %c0_54, %c0_55] : memref<5x128x128xf32, #tpu.memory_space<vmem>>, vector<1x128x128xf32>
    %99 = vector.shape_cast %98 : vector<1x128x128xf32> to vector<128x128xf32>
    %cst_56 = arith.constant dense<0.000000e+00> : vector<16x128xf32>
    %100 = tpu.matmul %97, %99, %cst_56 {dimension_numbers = #tpu.dot_dimension_numbers<[1], [0], [0], [1], [0, 0, 1, 1], [], []>} : vector<16x128xf32>, vector<128x128xf32>, vector<16x128xf32> -> vector<16x128xf32>
    %101 = arith.addf %89, %100 : vector<16x128xf32>
    %c2_57 = arith.constant 2 : index
    %c0_58 = arith.constant 0 : index
    %c0_59 = arith.constant 0 : index
    %102 = vector.load %arg8[%c2_57, %c0_58, %c0_59] : memref<5x128x128xf32, #tpu.memory_space<vmem>>, vector<1x128x128xf32>
    %103 = vector.shape_cast %102 : vector<1x128x128xf32> to vector<128x128xf32>
    %cst_60 = arith.constant dense<0.000000e+00> : vector<16x128xf32>
    %104 = tpu.matmul %76, %103, %cst_60 {dimension_numbers = #tpu.dot_dimension_numbers<[1], [0], [0], [1], [0, 0, 1, 1], [], []>} : vector<16x128xf32>, vector<128x128xf32>, vector<16x128xf32> -> vector<16x128xf32>
    %105 = arith.addf %101, %104 : vector<16x128xf32>
    %c15_i32_61 = arith.constant 15 : i32
    %106 = tpu.dynamic_rotate %76 by %c15_i32_61 dim 0 : vector<16x128xf32>, i32 -> vector<16x128xf32>
    %c-1_i32_62 = arith.constant -1 : i32
    %107 = vector.broadcast %c-1_i32_62 : i32 to vector<16x128xi32>
    %108 = arith.cmpi sge, %19, %107 : vector<16x128xi32>
    %c15_i32_63 = arith.constant 15 : i32
    %109 = vector.broadcast %c15_i32_63 : i32 to vector<16x128xi32>
    %110 = arith.cmpi slt, %19, %109 : vector<16x128xi32>
    %111 = arith.andi %108, %110 : vector<16x128xi1>
    %cst_64 = arith.constant 0.000000e+00 : f32
    %112 = vector.broadcast %cst_64 : f32 to vector<16x128xf32>
    %113 = arith.select %111, %106, %112 : vector<16x128xi1>, vector<16x128xf32>
    %c3_65 = arith.constant 3 : index
    %c0_66 = arith.constant 0 : index
    %c0_67 = arith.constant 0 : index
    %114 = vector.load %arg8[%c3_65, %c0_66, %c0_67] : memref<5x128x128xf32, #tpu.memory_space<vmem>>, vector<1x128x128xf32>
    %115 = vector.shape_cast %114 : vector<1x128x128xf32> to vector<128x128xf32>
    %cst_68 = arith.constant dense<0.000000e+00> : vector<16x128xf32>
    %116 = tpu.matmul %113, %115, %cst_68 {dimension_numbers = #tpu.dot_dimension_numbers<[1], [0], [0], [1], [0, 0, 1, 1], [], []>} : vector<16x128xf32>, vector<128x128xf32>, vector<16x128xf32> -> vector<16x128xf32>
    %117 = arith.addf %105, %116 : vector<16x128xf32>
    %c14_i32_69 = arith.constant 14 : i32
    %118 = tpu.dynamic_rotate %76 by %c14_i32_69 dim 0 : vector<16x128xf32>, i32 -> vector<16x128xf32>
    %c-2_i32_70 = arith.constant -2 : i32
    %119 = vector.broadcast %c-2_i32_70 : i32 to vector<16x128xi32>
    %120 = arith.cmpi sge, %19, %119 : vector<16x128xi32>
    %c14_i32_71 = arith.constant 14 : i32
    %121 = vector.broadcast %c14_i32_71 : i32 to vector<16x128xi32>
    %122 = arith.cmpi slt, %19, %121 : vector<16x128xi32>
    %123 = arith.andi %120, %122 : vector<16x128xi1>
    %cst_72 = arith.constant 0.000000e+00 : f32
    %124 = vector.broadcast %cst_72 : f32 to vector<16x128xf32>
    %125 = arith.select %123, %118, %124 : vector<16x128xi1>, vector<16x128xf32>
    %c4_73 = arith.constant 4 : index
    %c0_74 = arith.constant 0 : index
    %c0_75 = arith.constant 0 : index
    %126 = vector.load %arg8[%c4_73, %c0_74, %c0_75] : memref<5x128x128xf32, #tpu.memory_space<vmem>>, vector<1x128x128xf32>
    %127 = vector.shape_cast %126 : vector<1x128x128xf32> to vector<128x128xf32>
    %cst_76 = arith.constant dense<0.000000e+00> : vector<16x128xf32>
    %128 = tpu.matmul %125, %127, %cst_76 {dimension_numbers = #tpu.dot_dimension_numbers<[1], [0], [0], [1], [0, 0, 1, 1], [], []>} : vector<16x128xf32>, vector<128x128xf32>, vector<16x128xf32> -> vector<16x128xf32>
    %129 = arith.addf %117, %128 : vector<16x128xf32>
    %c0_77 = arith.constant 0 : index
    %c0_78 = arith.constant 0 : index
    %130 = vector.load %arg9[%c0_77, %c0_78] : memref<1x128xf32, #tpu.memory_space<vmem>>, vector<1x128xf32>
    %131 = vector.broadcast %130 : vector<1x128xf32> to vector<16x128xf32>
    %132 = arith.addf %129, %131 : vector<16x128xf32>
    %c0_79 = arith.constant 0 : index
    %c0_80 = arith.constant 0 : index
    %133 = vector.load %arg10[%c0_79, %c0_80] : memref<16x128xf32, #tpu.memory_space<vmem>>, vector<16x128xf32>
    %134 = arith.addf %132, %133 : vector<16x128xf32>
    %c0_81 = arith.constant 0 : index
    %c0_82 = arith.constant 0 : index
    %135 = vector.load %arg11[%c0_81, %c0_82] : memref<16x128xf32, #tpu.memory_space<vmem>>, vector<16x128xf32>
    tpu.vector_store %arg11[%c0_81, %c0_82], %134 {strides = array<i32>} : memref<16x128xf32, #tpu.memory_space<vmem>>, vector<16x128xf32>,
    return
  }
  func.func @transform_0(%arg0: i32) -> (i32, i32) {
    %c0_i32 = arith.constant 0 : i32
    %c0_i32_0 = arith.constant 0 : i32
    return %arg0, %c0_i32 : i32, i32
  }
  func.func @transform_1(%arg0: i32) -> (i32, i32) {
    %c0_i32 = arith.constant 0 : i32
    %c0_i32_0 = arith.constant 0 : i32
    %c0_i32_1 = arith.constant 0 : i32
    return %c0_i32, %c0_i32_0 : i32, i32
  }
  func.func @transform_2(%arg0: i32) -> (i32, i32) {
    %c0_i32 = arith.constant 0 : i32
    %c0_i32_0 = arith.constant 0 : i32
    %c0_i32_1 = arith.constant 0 : i32
    return %c0_i32, %c0_i32_0 : i32, i32
  }
  func.func @transform_3(%arg0: i32) -> (i32, i32) {
    %c0_i32 = arith.constant 0 : i32
    %c0_i32_0 = arith.constant 0 : i32
    %c0_i32_1 = arith.constant 0 : i32
    return %c0_i32, %c0_i32_0 : i32, i32
  }
  func.func @transform_4(%arg0: i32) -> (i32, i32) {
    %c0_i32 = arith.constant 0 : i32
    %c0_i32_0 = arith.constant 0 : i32
    %c0_i32_1 = arith.constant 0 : i32
    return %c0_i32, %c0_i32_0 : i32, i32
  }
  func.func @transform_5(%arg0: i32) -> (i32, i32, i32) {
    %c0_i32 = arith.constant 0 : i32
    %c0_i32_0 = arith.constant 0 : i32
    %c0_i32_1 = arith.constant 0 : i32
    %c0_i32_2 = arith.constant 0 : i32
    return %c0_i32, %c0_i32_0, %c0_i32_1 : i32, i32, i32
  }
  func.func @transform_6(%arg0: i32) -> (i32, i32) {
    %c0_i32 = arith.constant 0 : i32
    %c0_i32_0 = arith.constant 0 : i32
    %c0_i32_1 = arith.constant 0 : i32
    return %c0_i32, %c0_i32_0 : i32, i32
  }
  func.func @transform_7(%arg0: i32) -> (i32, i32, i32) {
    %c0_i32 = arith.constant 0 : i32
    %c0_i32_0 = arith.constant 0 : i32
    %c0_i32_1 = arith.constant 0 : i32
    %c0_i32_2 = arith.constant 0 : i32
    return %c0_i32, %c0_i32_0, %c0_i32_1 : i32, i32, i32
  }
  func.func @transform_8(%arg0: i32) -> (i32, i32) {
    %c0_i32 = arith.constant 0 : i32
    %c0_i32_0 = arith.constant 0 : i32
    %c0_i32_1 = arith.constant 0 : i32
    return %c0_i32, %c0_i32_0 : i32, i32
  }
  func.func @transform_9(%arg0: i32) -> (i32, i32) {
    %c0_i32 = arith.constant 0 : i32
    %c0_i32_0 = arith.constant 0 : i32
    return %arg0, %c0_i32 : i32, i32
  }
  func.func @transform_10(%arg0: i32) -> (i32, i32) {
    %c0_i32 = arith.constant 0 : i32
    %c0_i32_0 = arith.constant 0 : i32
    return %arg0, %c0_i32 : i32, i32
  }
}

</mosaic_0001>

<bundles_post_ra>
// kernel: parrotron_no_asr_forward.1
= control target key start
LH: loop header
LB: loop body
LE: loop exit
PB: predicated region body
PF: predicated region fallthrough
CT: control target
= control target key end

     0   :  { %s3753_s0 = inlined_call_operand.vmem [shape: f32[32,256], index: 0, kind: input, shape index: {}]   ;;  %s3754_s1 = inlined_call_operand.hbm [shape: f32[256,256], index: 1, kind: input, shape index: {}]   ;;  %s3755_s2 = inlined_call_operand.vmem [shape: f32[1,256], index: 2, kind: input, shape index: {}]   ;;  %s3756_s3 = inlined_call_operand.vmem [shape: f32[256,128], index: 3, kind: input, shape index: {}]   ;;  %s3757_s4 = inlined_call_operand.vmem [shape: f32[1,128], index: 4, kind: input, shape index: {}]   ;;  %s3758_s5 = inlined_call_operand.hbm [shape: f32[5,128,128], index: 5, kind: input, shape index: {}]   ;;  %s3759_s6 = inlined_call_operand.vmem [shape: f32[1,128], index: 6, kind: input, shape index: {}]   ;;  %s3760_s7 = inlined_call_operand.hbm [shape: f32[5,128,128], index: 7, kind: input, shape index: {}]   ;;  %s3761_s8 = inlined_call_operand.vmem [shape: f32[1,128], index: 8, kind: input, shape index: {}]   ;;  %s3762_s9 = inlined_call_operand.hbm [shape: f32[32,128], index: 9, kind: output, shape index: {0}]   ;;  %s3763_s10 = inlined_call_operand.hbm [shape: f32[32,128], index: 10, kind: output, shape index: {1}]  }
   0x1   :  { %3774 = sst [smem:[#allocation20_spill]] %s3758_s5 }
   0x2   :  { %16 = vsyncpa [#allocation3], 0 }
   0x3   :  { %17 = vsyncpa [#allocation6], 0 }
   0x4   :  { %18 = vsyncpa [#allocation4], 0 }
   0x5   :  { %20 = vsyncpa [#allocation4 + $0x1], 0 }
   0x6   :  { %21 = vsyncpa [#allocation10], 0 }
   0x7   :  { %23 = vsyncpa [#allocation10 + $0x1], 0  ;;  %s3285_s13 = smov 0   ;;  %s3287_s14 = smov 0  }
   0x8   :  { %s3289_s15 = smov 0   ;;  %s3291_s16 = smov 0  }
   0x9 LB: > { %3775 = sst [smem:[#allocation15_spill]] %s3205_s13  ;;  %s3306_s17 = sadd.s32 4294967295, %s3217_s16   ;;  %s3217_s16 = sphi %s3291_s16, %s3797_s16   ;;  %s3213_s15 = sphi %s3289_s15, %s3799_s15   ;;  %s3209_s14 = sphi %s3287_s14, %s3801_s14   ;;  %s3205_s13 = sphi %s3285_s13, %s3800_s13  }
   0xa   : > { %3776 = sst [smem:[#allocation16_spill]] %s3213_s15  ;;  %s1905_s18 = sadd.s32 4294967294, %s3217_s16  }
   0xb   : > { %s3310_s19 = sadd.s32 1, %s3217_s16   ;;  %s230_s20 = sadd.s32 1, %s3213_s15 }
   0xc   : > { %3777 = sst [smem:[#allocation17_spill]] %s3310_s19  ;;  %s227_s21 = ssub.s32 %s3217_s16, %s3310_s19 }
   0xd   : > { %p240_p0 = scmp.ne.s32.totalorder %s3213_s15, %s3209_s14  ;;  %p228_p1 = scmp.eq.s32.totalorder %s227_s21, 0 }
   0xe   : > { %p241_p2 = scmp.eq.s32.totalorder %s3306_s17, 1  ;;  %p246_p3 = scmp.ne.s32.totalorder %s3209_s14, %s3205_s13 }
   0xf   : > { %p247_p4 = scmp.eq.s32.totalorder %s1905_s18, 1  ;;  %p1906_p7 = scmp.ge.s32.totalorder %s3217_s16, 1 }
  0x10   : > { %s3321_s22 = scalar_select %p228_p1, %s3213_s15, %s230_s20  }
  0x11   : > { %p3323_p5 = por %p241_p2, %p240_p0  ;;  %p3327_p6 = por %p247_p4, %p246_p3 }
  0x12   : > { %3778 = sst [smem:[#allocation18_spill]] %s3321_s22  ;;  %p280_p8 = scmp.lt.s32.totalorder %s3217_s16, 3 }
  0x13   : > { %s3779_s23 = scalar_select %p3323_p5, 1, 0 }
  0x14   : > { %s3780_s24 = scalar_select %p3327_p6, 1, 0 }
  0x15   : > { %p3764_p9 = scmp.eq.s32.totalorder %s3306_s17, 0  ;;  %p3334_p10 = pnand %p1906_p7, %p280_p8 }
  0x16   : > { %3781 = sst [smem:[#allocation19_spill]] %s3780_s24  ;;  %s3219_s26 = smov [#allocation5]  }
  0x17   : > { %s3782_s25 = scalar_select %p3334_p10, 1, 0 }
  0x18   : > { %s314_s27 = sshll.u32 %s3219_s26, 4  ;;  %p2958_p11 = pneg %p3334_p10  ;;  %s315_s27 = int_to_ptr.vmem [resolvable:$true] %s314_s27 }
  0x19   : > { %s3220_s29 = smov [#allocation2]   ;;  %s3784_s5 = sld [smem:[#allocation20_spill]] }
  0x1a   : > { %p3342_p12 = pnand %p3764_p9, %p2958_p11  ;;  %s292_s30 = sshll.u32 %s3220_s29, 4  ;;  %s3346_s30 = int_to_ptr.vmem [resolvable:$true] %s292_s30 }
  0x1c   : > { %p3356_p0 = pneg %p3342_p12 }
  0x1f   : > { %s3031_s18 = scalar_lea.hbm %s3784_s5, 10240 }
  0x20   : > { %p3032_p13 = scmp.ne.s32.totalorder %s3784_s5, %s3031_s18  ;;  %p3038_p3 = scmp.lt.u32.totalorder %s3031_s18, %s3784_s5 }
  0x22   : > { %p3034_p1 = pnand %p3356_p0, %p3032_p13 }
  0x24   : > { %p3035_p2 = pneg %p3034_p1 }
  0x26   : > { %p3040_p4 = pnand %p3038_p3, %p3035_p2 }
  0x28   : > { %3043 = shalt.err (!%p3040_p4)
}
  0x29   : > { %s3044_s11 = scalar_lea.vmem %s315_s27, 10240  ;;  %p3052_p9 = scmp.lt.s32.totalorder %s315_s27, %s315_s27 }
  0x2a   : > { %p3045_p7 = scmp.ne.s32.totalorder %s315_s27, %s3044_s11  ;;  %p3053_p6 = scmp.lt.s32.totalorder %s3044_s11, %s3044_s11 }
  0x2c   : > { %p3047_p8 = pnand %p3045_p7, %p3356_p0  ;;  %p3054_p5 = por %p3053_p6, %p3052_p9 }
  0x2e   : > { %p3048_p11 = pneg %p3047_p8 }
  0x30   : > { %p3055_p10 = pnand %p3054_p5, %p3048_p11 }
  0x32   : > { %3058 = shalt.err (!%p3055_p10)
}
  0x33   : > { %s3772_s12 = smov 128   ;;  %s3773_s20 = smov 8  }
  0x34   : > { %2964 = dma.hbm_to_vmem [thread:$0]  (!%p3342_p12), %s3784_s5, 10240, %s315_s27, [#allocation6], %s3772_s12, %s3772_s12, %s3773_s20  }
  0x35   : > { %s3059_s15 = scalar_lea.hbm %s3754_s1, 8192 }
  0x36   : > { %p3060_p5 = scmp.ne.s32.totalorder %s3754_s1, %s3059_s15  ;;  %p3066_p10 = scmp.lt.u32.totalorder %s3059_s15, %s3754_s1 }
  0x38   : > { %p3062_p6 = pnand %p3060_p5, %p3356_p0 }
  0x3a   : > { %p3063_p9 = pneg %p3062_p6 }
  0x3c   : > { %p3068_p13 = pnand %p3066_p10, %p3063_p9 }
  0x3e   : > { %3071 = shalt.err (!%p3068_p13)
}
  0x3f   : > { %s3072_s27 = scalar_lea.vmem %s3346_s30, 8192  ;;  %p3080_p4 = scmp.lt.s32.totalorder %s3346_s30, %s3346_s30 }
  0x40   : > { %p3073_p1 = scmp.ne.s32.totalorder %s3346_s30, %s3072_s27  ;;  %p3081_p7 = scmp.lt.s32.totalorder %s3072_s27, %s3072_s27 }
  0x42   : > { %p3075_p2 = pnand %p3073_p1, %p3356_p0  ;;  %p3082_p8 = por %p3081_p7, %p3080_p4 }
  0x44   : > { %p3076_p3 = pneg %p3075_p2 }
  0x46   : > { %p3083_p11 = pnand %p3082_p8, %p3076_p3 }
  0x48   : > { %3086 = shalt.err (!%p3083_p11)
}
  0x49   : > { %s3223_s19 = smov 256   ;;  %s3224_s13 = smov 16  }
  0x4a   : > { %2961 = dma.hbm_to_vmem [thread:$0]  (!%p3342_p12), %s3754_s1, 8192, %s3346_s30, [#allocation3], %s3223_s19, %s3223_s19, %s3224_s13  }
  0x4b   : > { %s3225_s22 = smov [#allocation7]   ;;  %s3087_s11 = scalar_lea.hbm %s3760_s7, 10240 }
  0x4c   : > { %s330_s18 = sshll.u32 %s3225_s22, 4  ;;  %p3088_p5 = scmp.ne.s32.totalorder %s3760_s7, %s3087_s11  ;;  %s331_s18 = int_to_ptr.vmem [resolvable:$true] %s330_s18 }
  0x4d   : > { %p3094_p10 = scmp.lt.u32.totalorder %s3087_s11, %s3760_s7 }
  0x4e   : > { %p3090_p6 = pnand %p3088_p5, %p3356_p0 }
  0x50   : > { %p3091_p9 = pneg %p3090_p6 }
  0x52   : > { %p3096_p13 = pnand %p3094_p10, %p3091_p9 }
  0x54   : > { %3099 = shalt.err (!%p3096_p13)
}
  0x55   : > { %s3100_s30 = scalar_lea.vmem %s331_s18, 10240  ;;  %p3108_p4 = scmp.lt.s32.totalorder %s331_s18, %s331_s18 }
  0x56   : > { %p3101_p1 = scmp.ne.s32.totalorder %s331_s18, %s3100_s30  ;;  %p3109_p7 = scmp.lt.s32.totalorder %s3100_s30, %s3100_s30 }
  0x58   : > { %p3103_p2 = pnand %p3101_p1, %p3356_p0  ;;  %p3110_p8 = por %p3109_p7, %p3108_p4 }
  0x5a   : > { %p3104_p3 = pneg %p3103_p2 }
  0x5c   : > { %p3111_p11 = pnand %p3110_p8, %p3104_p3 }
  0x5e   : > { %3114 = shalt.err (!%p3111_p11)
}
  0x5f   : > { %s3786_s12 = smov 8   ;;  %s3787_s19 = smov 128  }
  0x60   : > { %2967 = dma.hbm_to_vmem [thread:$0]  (!%p3342_p12), %s3760_s7, 10240, %s331_s18, [#allocation6], %s3787_s19, %s3787_s19, %s3786_s12  }
  0x61   : > { %p3788_p5 = scmp.ne.s32.totalorder %s3782_s25, 0 }
  0x62   : > { %p3789_p0 = scmp.eq.s32.totalorder (!%p3788_p5), %s3306_s17, 0 }
  0x63   : > { %359 = sbr.rel (%p3788_p5) target bundleno = 1344 (0x540), region = 56 }
  0x6a   : > { %3188 = dma.done.wait (%p3789_p0), [#allocation3], 8192   ;;  %p3790_p6 = pmov %p3789_p0 }
  0x6b   : > { %p3791_p9 = pmov %p3789_p0 }
  0x6c   : > { %3190 = vsyncadd (%p3790_p6), [#allocation3], 4294959104 }
  0x6d   : > { %3192 = dma.done.wait (%p3791_p9), [#allocation6], 20480   ;;  %p3792_p10 = pmov %p3789_p0 }
  0x6e   : > { %v425_v0 = vld [vmem:[#allocation2 + $0x8] sm:$0xff]  ;;  %v427_v1 = vld [vmem:[#allocation2 + $0x18] sm:$0xff]  ;;  %v424_v2 = vld [vmem:[#allocation2] sm:$0xff]  ;;  %s1917_s25 = sshll.u32 %s3306_s17, 1  ;;  %s3543_s24 = sand.u32 1, %s3209_s14  }
  0x6f   : > { %3194 = vsyncadd (%p3792_p10), [#allocation6], 4294946816  ;;  %v2510_v3 = vpack.c.bf16 %v427_v1, %v425_v0  ;;  %v426_v4 = vld [vmem:[#allocation2 + $0x10] sm:$0xff]  ;;  %v429_v5 = vld [vmem:[#allocation2 + $0x28] sm:$0xff]  ;;  %p412_p12 = scmp.lt.s32.totalorder %s1917_s25, 3  ;;  %s1915_s22 = sshll.u32 %s3543_s24, 4 }
  0x70   : > { %v431_v6 = vld [vmem:[#allocation2 + $0x38] sm:$0xff]  ;;  %v2512_v7 = vpack.c.bf16 %v426_v4, %v424_v2  ;;  %v428_v9 = vld [vmem:[#allocation2 + $0x20] sm:$0xff]  ;;  %v430_v10 = vld [vmem:[#allocation2 + $0x30] sm:$0xff]  ;;  %s3553_s29 = scalar_lea.vmem [#allocation8], %s1915_s22  ;;  %s1940_s30 = sshll.u32 %s3306_s17, 8 }
  0x71   : > { %v2514_v8 = vpack.c.bf16 %v431_v6, %v429_v5  ;;  %v433_v11 = vld [vmem:[#allocation2 + $0x48] sm:$0xff]  ;;  %2511 = vmatprep.subr.bf16.mxu0 %v2510_v3  ;;  %v435_v12 = vld [vmem:[#allocation2 + $0x58] sm:$0xff]  ;;  %v2516_v13 = vpack.c.bf16 %v430_v10, %v428_v9  ;;  %v432_v15 = vld [vmem:[#allocation2 + $0x40] sm:$0xff]  ;;  %s3803_s25 = smov (!%p412_p12, %s1917_s25), 3  ;;  %s3661_s5 = scalar_lea.hbm %s3762_s9, %s1940_s30 }
  0x72   : > { %2513 = vmatpush1.bf16.msra.mxu0 %v2512_v7  ;;  %v2518_v14 = vpack.c.bf16 %v435_v12, %v433_v11  ;;  %v434_v16 = vld [vmem:[#allocation2 + $0x50] sm:$0xff]  ;;  %v437_v17 = vld [vmem:[#allocation2 + $0x68] sm:$0xff]  ;;  %v439_v18 = vld [vmem:[#allocation2 + $0x78] sm:$0xff]  ;;  %s1939_s28 = sshll.u32 %s3803_s25, 4  ;;  %s1764_s20 = sshll.u32 %s3553_s29, 4  ;;  %s3664_s20 = int_to_ptr.vmem [resolvable:$true] %s1764_s20 }
  0x73   : > { %2515 = vmatprep.subr.bf16.mxu0 %v2514_v8  ;;  %v2520_v19 = vpack.c.bf16 %v434_v16, %v432_v15  ;;  %v2522_v20 = vpack.c.bf16 %v439_v18, %v437_v17  ;;  %v436_v21 = vld [vmem:[#allocation2 + $0x60] sm:$0xff]  ;;  %v438_v22 = vld [vmem:[#allocation2 + $0x70] sm:$0xff]  ;;  %v441_v23 = vld [vmem:[#allocation2 + $0x88] sm:$0xff]  ;;  %s3433_s15 = scalar_lea.vmem %s3753_s0, %s1939_s28  ;;  %s1746_s25 = scalar_lea.sflag [#allocation4], %s3543_s24 }
  0x74   : > { %v443_v24 = vld [vmem:[#allocation2 + $0x98] sm:$0xff]  ;;  %v2524_v25 = vpack.c.bf16 %v438_v22, %v436_v21  ;;  %v440_v27 = vld [vmem:[#allocation2 + $0x80] sm:$0xff]  ;;  %v442_v28 = vld [vmem:[#allocation2 + $0x90] sm:$0xff]  ;;  %s3115_s28 = scalar_lea.vmem %s3664_s20, 256  ;;  %p3793_p1 = scmp.ne.s32.totalorder %s3779_s23, 0 }
  0x75   : > { %v2526_v26 = vpack.c.bf16 %v443_v24, %v441_v23  ;;  %v445_v29 = vld [vmem:[#allocation2 + $0xa8] sm:$0xff]  ;;  %v447_v30 = vld [vmem:[#allocation2 + $0xb8] sm:$0xff]  ;;  %v2528_v31 = vpack.c.bf16 %v442_v28, %v440_v27  ;;  %v444_v33 = vld [vmem:[#allocation2 + $0xa0] sm:$0xff]  ;;  %p3116_p13 = scmp.ne.s32.totalorder %s3664_s20, %s3115_s28  ;;  %s3226_s26 = smov [#allocation8]  }
  0x76   : > { %2517 = vmatpush1.bf16.msra.mxu0 %v2516_v13  ;;  %v2530_v32 = vpack.c.bf16 %v447_v30, %v445_v29  ;;  %v446_v34 = vld [vmem:[#allocation2 + $0xb0] sm:$0xff]  ;;  %v449_v35 = vld [vmem:[#allocation2 + $0xc8] sm:$0xff]  ;;  %v451_v36 = vld [vmem:[#allocation2 + $0xd8] sm:$0xff]  ;;  %s3119_s13 = sshll.u32 %s3226_s26, 4  ;;  %s3120_s13 = int_to_ptr.vmem [resolvable:$false] %s3119_s13 }
  0x77   : > { %2519 = vmatprep.subr.bf16.mxu0 %v2518_v14  ;;  %v2532_v37 = vpack.c.bf16 %v446_v34, %v444_v33  ;;  %v2534_v38 = vpack.c.bf16 %v451_v36, %v449_v35  ;;  %v448_v39 = vld [vmem:[#allocation2 + $0xc0] sm:$0xff]  ;;  %v450_v40 = vld [vmem:[#allocation2 + $0xd0] sm:$0xff]  ;;  %v421_v41 = vld [vmem:[%s3433_s15 + $0x8] sm:$0xff]  ;;  %p3117_p2 = pnand %p3116_p13, %p3793_p1  ;;  %p3122_p4 = scmp.lt.s32.totalorder %s3664_s20, %s3120_s13 }
  0x78   : > { %v453_v42 = vld [vmem:[#allocation2 + $0xe8] sm:$0xff]  ;;  %v455_v43 = vld [vmem:[#allocation2 + $0xf8] sm:$0xff]  ;;  %564 = vmatprep.mubr.f32.mxu0 %v421_v41  ;;  %v610_v44 = vld [vmem:[%s3756_s3 + $0x80] sm:$0xff]  ;;  %v2536_v50 = vpack.c.bf16 %v450_v40, %v448_v39 }
  0x79   : > { %v452_v45 = vld [vmem:[#allocation2 + $0xe0] sm:$0xff]  ;;  %v454_v46 = vld [vmem:[#allocation2 + $0xf0] sm:$0xff]  ;;  %v611_v47 = vld [vmem:[%s3756_s3 + $0x88] sm:$0xff]  ;;  %v2538_v56 = vpack.c.bf16 %v455_v43, %v453_v42  ;;  %p3118_p3 = pneg %p3117_p2 }
  0x7a   : > { %2521 = vmatpush1.bf16.msra.mxu0 %v2520_v19  ;;  %v594_v48 = vld [vmem:[%s3756_s3] sm:$0xff]  ;;  %v595_v49 = vld [vmem:[%s3756_s3 + $0x8] sm:$0xff]  ;;  %v2574_v51 = vpack.c.bf16 %v611_v47, %v610_v44  ;;  %v612_v53 = vld [vmem:[%s3756_s3 + $0x90] sm:$0xff]  ;;  %v2540_v0 = vpack.c.bf16 %v454_v46, %v452_v45 }
  0x7b   : > { %2523 = vmatprep.subr.bf16.mxu0 %v2522_v20  ;;  %v2576_v52 = vpack.c.bf16 %v595_v49, %v594_v48  ;;  %v613_v54 = vld [vmem:[%s3756_s3 + $0x98] sm:$0xff]  ;;  %v596_v55 = vld [vmem:[%s3756_s3 + $0x10] sm:$0xff]  ;;  %v614_v59 = vld [vmem:[%s3756_s3 + $0xa0] sm:$0xff] }
  0x7c   : > { %v2578_v57 = vpack.c.bf16 %v613_v54, %v612_v53  ;;  %v597_v58 = vld [vmem:[%s3756_s3 + $0x18] sm:$0xff]  ;;  %v615_v60 = vld [vmem:[%s3756_s3 + $0xa8] sm:$0xff]  ;;  %2575 = vmatprep.subr.bf16.mxu1 %v2574_v51  ;;  %v456_v1 = vld [vmem:[#allocation2 + $0x100] sm:$0xff] }
  0x7d   : > { %v457_v61 = vld [vmem:[#allocation2 + $0x108] sm:$0xff]  ;;  %v459_v62 = vld [vmem:[#allocation2 + $0x118] sm:$0xff]  ;;  %2577 = vmatpush3.bf16.msra.mxu1 %v2576_v52  ;;  %v2580_v63 = vpack.c.bf16 %v597_v58, %v596_v55  ;;  %v2582_v2 = vpack.c.bf16 %v615_v60, %v614_v59  ;;  %v598_v3 = vld [vmem:[%s3756_s3 + $0x20] sm:$0xff] }
  0x7e   : > { %2525 = vmatpush1.bf16.msra.mxu0 %v2524_v25  ;;  %2579 = vmatprep.subr.bf16.mxu1 %v2578_v57  ;;  %v599_v4 = vld [vmem:[%s3756_s3 + $0x28] sm:$0xff]  ;;  %v2542_v5 = vpack.c.bf16 %v459_v62, %v457_v61  ;;  %v458_v6 = vld [vmem:[#allocation2 + $0x110] sm:$0xff]  ;;  %v617_v8 = vld [vmem:[%s3756_s3 + $0xb8] sm:$0xff] }
  0x7f   : > { %2527 = vmatprep.subr.bf16.mxu0 %v2526_v26  ;;  %v616_v7 = vld [vmem:[%s3756_s3 + $0xb0] sm:$0xff]  ;;  %v461_v9 = vld [vmem:[#allocation2 + $0x128] sm:$0xff]  ;;  %v463_v10 = vld [vmem:[#allocation2 + $0x138] sm:$0xff]  ;;  %v2584_v11 = vpack.c.bf16 %v599_v4, %v598_v3  ;;  %v2544_v12 = vpack.c.bf16 %v458_v6, %v456_v1 }
  0x80   : > { %v460_v13 = vld [vmem:[#allocation2 + $0x120] sm:$0xff]  ;;  %v2586_v14 = vpack.c.bf16 %v617_v8, %v616_v7  ;;  %v600_v15 = vld [vmem:[%s3756_s3 + $0x30] sm:$0xff]  ;;  %v601_v16 = vld [vmem:[%s3756_s3 + $0x38] sm:$0xff]  ;;  %v2546_v17 = vpack.c.bf16 %v463_v10, %v461_v9 }
  0x81   : > { %2581 = vmatpush3.bf16.msra.mxu1 %v2580_v63  ;;  %v462_v18 = vld [vmem:[#allocation2 + $0x130] sm:$0xff]  ;;  %v618_v19 = vld [vmem:[%s3756_s3 + $0xc0] sm:$0xff]  ;;  %v619_v20 = vld [vmem:[%s3756_s3 + $0xc8] sm:$0xff]  ;;  %v2588_v23 = vpack.c.bf16 %v601_v16, %v600_v15 }
  0x82   : > { %2529 = vmatpush1.bf16.msra.mxu0 %v2528_v31  ;;  %2583 = vmatprep.subr.bf16.mxu1 %v2582_v2  ;;  %v465_v21 = vld [vmem:[#allocation2 + $0x148] sm:$0xff]  ;;  %v467_v22 = vld [vmem:[#allocation2 + $0x158] sm:$0xff]  ;;  %v2548_v24 = vpack.c.bf16 %v462_v18, %v460_v13  ;;  %v2590_v25 = vpack.c.bf16 %v619_v20, %v618_v19  ;;  %v602_v26 = vld [vmem:[%s3756_s3 + $0x40] sm:$0xff] }
  0x83   : > { %2531 = vmatprep.subr.bf16.mxu0 %v2530_v32  ;;  %v603_v27 = vld [vmem:[%s3756_s3 + $0x48] sm:$0xff]  ;;  %v2550_v28 = vpack.c.bf16 %v467_v22, %v465_v21  ;;  %v464_v29 = vld [vmem:[#allocation2 + $0x140] sm:$0xff]  ;;  %v466_v30 = vld [vmem:[#allocation2 + $0x150] sm:$0xff] }
  0x84   : > { %v469_v31 = vld [vmem:[#allocation2 + $0x168] sm:$0xff]  ;;  %v471_v32 = vld [vmem:[#allocation2 + $0x178] sm:$0xff]  ;;  %v2592_v33 = vpack.c.bf16 %v603_v27, %v602_v26  ;;  %v2552_v34 = vpack.c.bf16 %v466_v30, %v464_v29  ;;  %v468_v36 = vld [vmem:[#allocation2 + $0x160] sm:$0xff] }
  0x85   : > { %2585 = vmatpush3.bf16.msra.mxu1 %v2584_v11  ;;  %v2554_v35 = vpack.c.bf16 %v471_v32, %v469_v31  ;;  %v475_v39 = vld [vmem:[#allocation2 + $0x198] sm:$0xff]  ;;  %v472_v42 = vld [vmem:[#allocation2 + $0x180] sm:$0xff]  ;;  %v474_v43 = vld [vmem:[#allocation2 + $0x190] sm:$0xff] }
  0x86   : > { %2533 = vmatpush1.bf16.msra.mxu0 %v2532_v37  ;;  %2587 = vmatprep.subr.bf16.mxu1 %v2586_v14  ;;  %v470_v37 = vld [vmem:[#allocation2 + $0x170] sm:$0xff]  ;;  %v477_v44 = vld [vmem:[#allocation2 + $0x1a8] sm:$0xff]  ;;  %v479_v45 = vld [vmem:[#allocation2 + $0x1b8] sm:$0xff]  ;;  %v2560_v46 = vpack.c.bf16 %v474_v43, %v472_v42 }
  0x87   : > { %2535 = vmatprep.subr.bf16.mxu0 %v2534_v38  ;;  %v473_v38 = vld [vmem:[#allocation2 + $0x188] sm:$0xff]  ;;  %v2556_v40 = vpack.c.bf16 %v470_v37, %v468_v36  ;;  %v2562_v47 = vpack.c.bf16 %v479_v45, %v477_v44  ;;  %v476_v48 = vld [vmem:[#allocation2 + $0x1a0] sm:$0xff]  ;;  %v478_v49 = vld [vmem:[#allocation2 + $0x1b0] sm:$0xff] }
  0x88   : > { %v2558_v41 = vpack.c.bf16 %v475_v39, %v473_v38  ;;  %v483_v51 = vld [vmem:[#allocation2 + $0x1d8] sm:$0xff]  ;;  %v2564_v52 = vpack.c.bf16 %v478_v49, %v476_v48  ;;  %v480_v54 = vld [vmem:[#allocation2 + $0x1c0] sm:$0xff]  ;;  %v482_v55 = vld [vmem:[#allocation2 + $0x1d0] sm:$0xff] }
  0x89   : > { %2589 = vmatpush3.bf16.msra.mxu1 %v2588_v23  ;;  %v487_v57 = vld [vmem:[#allocation2 + $0x1f8] sm:$0xff]  ;;  %v2568_v58 = vpack.c.bf16 %v482_v55, %v480_v54  ;;  %v484_v60 = vld [vmem:[#allocation2 + $0x1e0] sm:$0xff]  ;;  %v486_v61 = vld [vmem:[#allocation2 + $0x1f0] sm:$0xff]  ;;  %v490_v23 = vlaneseq }
  0x8a   : > { %2537 = vmatpush1.bf16.msra.mxu0 %v2536_v50  ;;  %2591 = vmatprep.subr.bf16.mxu1 %v2590_v25  ;;  %v481_v50 = vld [vmem:[#allocation2 + $0x1c8] sm:$0xff]  ;;  %v2572_v62 = vpack.c.bf16 %v486_v61, %v484_v60  ;;  %v420_v63 = vld [vmem:[%s3433_s15] sm:$0xff]  ;;  %v422_v1 = vld [vmem:[%s3433_s15 + $0x10] sm:$0xff] }
  0x8b   : > { %2539 = vmatprep.subr.bf16.mxu0 %v2538_v56  ;;  %v2566_v53 = vpack.c.bf16 %v483_v51, %v481_v50  ;;  %v485_v56 = vld [vmem:[#allocation2 + $0x1e8] sm:$0xff]  ;;  %v620_v2 = vld [vmem:[%s3756_s3 + $0xd0] sm:$0xff]  ;;  %v621_v3 = vld [vmem:[%s3756_s3 + $0xd8] sm:$0xff] }
  0x8c   : > { %v2570_v59 = vpack.c.bf16 %v487_v57, %v485_v56  ;;  %v2594_v4 = vpack.c.bf16 %v621_v3, %v620_v2  ;;  %v605_v6 = vld [vmem:[%s3756_s3 + $0x58] sm:$0xff]  ;;  %v622_v8 = vld [vmem:[%s3756_s3 + $0xe0] sm:$0xff]  ;;  %v623_v9 = vld [vmem:[%s3756_s3 + $0xe8] sm:$0xff] }
  0x8d   : > { %2593 = vmatpush3.bf16.msra.mxu1 %v2592_v33  ;;  %v2598_v10 = vpack.c.bf16 %v623_v9, %v622_v8  ;;  %v606_v11 = vld [vmem:[%s3756_s3 + $0x60] sm:$0xff]  ;;  %v624_v14 = vld [vmem:[%s3756_s3 + $0xf0] sm:$0xff]  ;;  %v625_v15 = vld [vmem:[%s3756_s3 + $0xf8] sm:$0xff] }
  0x8e   : > { %2541 = vmatpush1.bf16.msra.mxu0 %v2540_v0  ;;  %v423_v0 = vld [vmem:[%s3433_s15 + $0x18] sm:$0xff]  ;;  %2595 = vmatprep.subr.bf16.mxu1 %v2594_v4  ;;  %v2602_v16 = vpack.c.bf16 %v625_v15, %v624_v14  ;;  %v756_v20 = vld [vmem:[#allocation5 + $0x80] sm:$0xff]  ;;  %v757_v21 = vld [vmem:[#allocation5 + $0x88] sm:$0xff]  ;;  %s3121_s15 = scalar_lea.vmem %s3120_s13, 512 }
  0x8f   : > { %2543 = vmatprep.subr.bf16.mxu0 %v2542_v5  ;;  %v604_v5 = vld [vmem:[%s3756_s3 + $0x50] sm:$0xff]  ;;  %v609_v18 = vld [vmem:[%s3756_s3 + $0x78] sm:$0xff]  ;;  %v2606_v22 = vpack.c.bf16 %v757_v21, %v756_v20  ;;  %v488_v26 = vld [vmem:[%s3755_s2] sm:$0x3]  ;;  %p3123_p7 = scmp.lt.s32.totalorder %s3121_s15, %s3115_s28 }
  0x90   : > { %v2596_v7 = vpack.c.bf16 %v605_v6, %v604_v5  ;;  %v758_v39 = vld [vmem:[#allocation5 + $0x90] sm:$0xff]  ;;  %v760_v44 = vld [vmem:[#allocation5 + $0xa0] sm:$0xff]  ;;  %v761_v45 = vld [vmem:[#allocation5 + $0xa8] sm:$0xff] }
  0x91   : > { %v762_v48 = vld [vmem:[#allocation5 + $0xb0] sm:$0xff]  ;;  %v763_v49 = vld [vmem:[#allocation5 + $0xb8] sm:$0xff]  ;;  %v764_v51 = vld [vmem:[#allocation5 + $0xc0] sm:$0xff]  ;;  %p3124_p8 = por %p3123_p7, %p3122_p4 }
  0x92   : > { %2545 = vmatpush1.bf16.msra.mxu0 %v2544_v12  ;;  %2597 = vmatpush3.bf16.msra.mxu1 %v2596_v7  ;;  %v607_v12 = vld [vmem:[%s3756_s3 + $0x68] sm:$0xff]  ;;  %v2618_v50 = vpack.c.bf16 %v763_v49, %v762_v48  ;;  %v766_v54 = vld [vmem:[#allocation5 + $0xd0] sm:$0xff]  ;;  %v767_v55 = vld [vmem:[#allocation5 + $0xd8] sm:$0xff] }
  0x93   : > { %2547 = vmatprep.subr.bf16.mxu0 %v2546_v17  ;;  %v2600_v13 = vpack.c.bf16 %v607_v12, %v606_v11  ;;  %2599 = vmatprep.subr.bf16.mxu1 %v2598_v10  ;;  %v608_v17 = vld [vmem:[%s3756_s3 + $0x70] sm:$0xff]  ;;  %v2626_v56 = vpack.c.bf16 %v767_v55, %v766_v54  ;;  %v768_v57 = vld [vmem:[#allocation5 + $0xe0] sm:$0xff]  ;;  %v771_v61 = vld [vmem:[#allocation5 + $0xf8] sm:$0xff]  ;;  %p3125_p11 = pnand %p3124_p8, %p3118_p3 }
  0x94   : > { %v2604_v19 = vpack.c.bf16 %v609_v18, %v608_v17  ;;  %v770_v60 = vld [vmem:[#allocation5 + $0xf0] sm:$0xff]  ;;  %v1920_v3 = vld [vmem:[%s3757_s4] ss:$0 sm:$0xff]  ;;  %v729_v12 = vld [vmem:[#allocation5 + $0x18] sm:$0xff] }
  0x95   : > { %v728_v11 = vld [vmem:[#allocation5 + $0x10] sm:$0xff]  ;;  %v730_v20 = vld [vmem:[#allocation5 + $0x20] sm:$0xff]  ;;  %v731_v21 = vld [vmem:[#allocation5 + $0x28] sm:$0xff] }
  0x96   : > { %2549 = vmatpush1.bf16.msra.mxu0 %v2548_v24  ;;  %2601 = vmatpush3.bf16.msra.mxu1 %v2600_v13  ;;  %v3535_v24 = vshrl.u32 %v490_v23, 7  ;;  %v1270_v23 = vld [vmem:[#allocation7 + $0x80] sm:$0xff]  ;;  %v740_v49 = vld [vmem:[#allocation5 + $0x70] sm:$0xff] }
  0x97   : > { %2551 = vmatprep.subr.bf16.mxu0 %v2550_v28  ;;  %2603 = vmatprep.subr.bf16.mxu1 %v2602_v16  ;;  %v925_v55 = vld [vmem:[#allocation5 + $0x110] sm:$0xff] }
  0x98   : > { %v492_v25 = vsub.s32 0, %v3535_v24  ;;  %v496_v27 = vsub.s32 1, %v3535_v24  ;;  %vm744_vm0 = vcmp.lt.s32.totalorder %v3535_v24, 1  ;;  %vm747_vm1 = vcmp.ge.s32.totalorder %v3535_v24, 1 }
  0x99   : > { %vm715_vm2 = vcmp.lt.s32.totalorder %v3535_v24, 2  ;;  %vm718_vm3 = vcmp.ge.s32.totalorder %v3535_v24, 2  ;;  %vm1018_vm4 = vcmp.lt.s32.totalorder %v3535_v24, 7  ;;  %vm1125_vm6 = vcmp.lt.s32.totalorder %v3535_v24, 6 }
  0x9a   : > { %2553 = vmatpush1.bf16.msra.mxu0 %v2552_v34  ;;  %2605 = vmatpush3.bf16.msra.mxu1 %v2604_v19  ;;  %v493_v28 = vrot.slane %v488_v26, %v492_v25  ;;  %v497_v29 = vrot.slane %v488_v26, %v496_v27  ;;  %v2642_v19 = vpack.c.bf16 %v729_v12, %v728_v11  ;;  %v1271_v25 = vld [vmem:[#allocation7 + $0x88] sm:$0xff]  ;;  %v1272_v26 = vld [vmem:[#allocation7 + $0x90] sm:$0xff] }
  0x9b   : > { %2555 = vmatprep.subr.bf16.mxu0 %v2554_v35  ;;  %2607 = vmatprep.subr.bf16.mxu1 %v2606_v22  ;;  %v2766_v27 = vpack.c.bf16 %v1271_v25, %v1270_v23  ;;  %v937_v12 = vld [vmem:[#allocation5 + $0x170] sm:$0xff]  ;;  %v1034_v23 = vld [vmem:[#allocation5 + $0x1a0] sm:$0xff]  ;;  %v1035_v25 = vld [vmem:[#allocation5 + $0x1a8] sm:$0xff] }
  0x9e   : > { %2557 = vmatpush1.bf16.msra.mxu0 %v2556_v40  ;;  %v759_v40 = vld [vmem:[#allocation5 + $0x98] sm:$0xff] }
  0x9f   : > { %2559 = vmatprep.subr.bf16.mxu0 %v2558_v41  ;;  %v2610_v41 = vpack.c.bf16 %v759_v40, %v758_v39  ;;  %v734_v39 = vld [vmem:[#allocation5 + $0x40] sm:$0xff]  ;;  %v735_v40 = vld [vmem:[#allocation5 + $0x48] sm:$0xff] }
  0xa2   : > { %2561 = vmatpush1.bf16.msra.mxu0 %v2560_v46  ;;  %v2614_v46 = vpack.c.bf16 %v761_v45, %v760_v44  ;;  %v737_v44 = vld [vmem:[#allocation5 + $0x58] sm:$0xff] }
  0xa3   : > { %2563 = vmatprep.subr.bf16.mxu0 %v2562_v47 }
  0xa6   : > { %2565 = vmatpush1.bf16.msra.mxu0 %v2564_v52  ;;  %v765_v52 = vld [vmem:[#allocation5 + $0xc8] sm:$0xff] }
  0xa7   : > { %2567 = vmatprep.subr.bf16.mxu0 %v2566_v53  ;;  %v2622_v53 = vpack.c.bf16 %v765_v52, %v764_v51  ;;  %v923_v52 = vld [vmem:[#allocation5 + $0x100] sm:$0xff] }
  0xaa   : > { %2569 = vmatpush1.bf16.msra.mxu0 %v2568_v58  ;;  %v769_v58 = vld [vmem:[#allocation5 + $0xe8] sm:$0xff] }
  0xab   : > { %2571 = vmatprep.subr.bf16.mxu0 %v2570_v59  ;;  %v2630_v59 = vpack.c.bf16 %v769_v58, %v768_v57 }
  0xae   : > { %2573 = vmatpush1.bf16.msra.mxu0 %v2572_v62  ;;  %v2634_v62 = vpack.c.bf16 %v771_v61, %v770_v60  ;;  %v928_v60 = vld [vmem:[#allocation5 + $0x128] sm:$0xff] }
  0xaf   : > { %2767 = vmatprep.subr.bf16.mxu0 %v2766_v27 }
  0xb1   : > { %565 = vmatmul.mubr.f32.vlgmr.msra.gmra.mrb[0].mxu0 %v420_v63  ;;  %v726_v63 = vld [vmem:[#allocation5] sm:$0xff] }
  0xb2   : > { %570 = vmatprep.mubr.f32.mxu0 %v423_v0  ;;  %v727_v0 = vld [vmem:[#allocation5 + $0x8] sm:$0xff]  ;;  %2769 = vmatpush3.bf16.msra.mxu0 %v2766_v27  ;;  %v2710_v27 = vpack.c.bf16 %v1035_v25, %v1034_v23  ;;  %v1247_v23 = vld [vmem:[#allocation7] sm:$0xff] }
  0xb3   : > { %v1248_v25 = vld [vmem:[#allocation7 + $0x8] sm:$0xff] }
  0xb5   : > { %571 = vmatmul.mubr.f32.gmra.mrb[2].mxu0 %v422_v1  ;;  %v2638_v1 = vpack.c.bf16 %v727_v0, %v726_v63  ;;  %v930_v63 = vld [vmem:[#allocation5 + $0x138] sm:$0xff] }
 0x184   : > { %v566_v30 = vpop.f32.mrb[0].mxu0 }
 0x185   : > { %v567_v31 = vadd.f32 %v566_v30, %v493_v28  ;;  %v568_v32 = vpop.f32.mrb[1].mxu0 }
 0x186   : > { %v569_v33 = vadd.f32 %v568_v32, %v497_v29  ;;  %v1275_v32 = vld [vmem:[#allocation7 + $0xa8] sm:$0xff] }
 0x187   : > { %3023 = vtanh.f32 %v567_v31  ;;  %v1274_v31 = vld [vmem:[#allocation7 + $0xa0] sm:$0xff] }
 0x188   : > { %v572_v34 = vpop.f32.mrb[2].mxu0  ;;  %v587_v35 = vmax.f32 %v569_v33, 0.0  ;;  %v732_v33 = vld [vmem:[#allocation5 + $0x30] sm:$0xff] }
 0x189   : > { %v573_v36 = vadd.f32 %v572_v34, %v493_v28  ;;  %v574_v37 = vpop.f32.mrb[3].mxu0  ;;  %v1273_v28 = vld [vmem:[#allocation7 + $0x98] sm:$0xff] }
 0x18a   : > { %697 = vmatprep.mubr.f32.mxu1 %v587_v35  ;;  %v575_v38 = vadd.f32 %v574_v37, %v497_v29  ;;  %v2646_v29 = vpack.c.bf16 %v731_v21, %v730_v20  ;;  %v2770_v30 = vpack.c.bf16 %v1273_v28, %v1272_v26  ;;  %v733_v34 = vld [vmem:[#allocation5 + $0x38] sm:$0xff]  ;;  %v2774_v35 = vpack.c.bf16 %v1275_v32, %v1274_v31  ;;  %v1276_v37 = vld [vmem:[#allocation7 + $0xb0] sm:$0xff]  ;;  %v1038_v31 = vld [vmem:[#allocation5 + $0x1c0] sm:$0xff] }
 0x18b   : > { %3025 = vtanh.f32 %v573_v36  ;;  %v2650_v36 = vpack.c.bf16 %v733_v34, %v732_v33  ;;  %v1036_v28 = vld [vmem:[#allocation5 + $0x1b0] sm:$0xff]  ;;  %v1039_v32 = vld [vmem:[#allocation5 + $0x1c8] sm:$0xff] }
 0x18c   : > { %v589_v43 = vmax.f32 %v575_v38, 0.0  ;;  %2771 = vmatprep.subr.bf16.mxu0 %v2770_v30  ;;  %v1277_v38 = vld [vmem:[#allocation7 + $0xb8] sm:$0xff]  ;;  %v2718_v33 = vpack.c.bf16 %v1039_v32, %v1038_v31  ;;  %v1040_v34 = vld [vmem:[#allocation5 + $0x1d0] sm:$0xff] }
 0x18d   : > { %2773 = vmatpush3.bf16.msra.mxu0 %v2770_v30 }
 0x18e   : > { %2775 = vmatprep.subr.bf16.mxu0 %v2774_v35 }
 0x191   : > { %v3024_v42 = vpop.eup %3023  ;;  %2777 = vmatpush3.bf16.msra.mxu0 %v2774_v35  ;;  %v1041_v35 = vld [vmem:[#allocation5 + $0x1d8] sm:$0xff] }
 0x192   : > { %698 = vmatmul.mubr.f32.vlgmr.msra.gmra.mrb[0].mxu1 %v3024_v42  ;;  %v2654_v42 = vpack.c.bf16 %v735_v40, %v734_v39  ;;  %v1044_v40 = vld [vmem:[#allocation5 + $0x1f0] sm:$0xff] }
 0x193   : > { %702 = vmatprep.mubr.f32.mxu1 %v589_v43  ;;  %2609 = vmatpush3.bf16.msra.mxu1 %v2606_v22  ;;  %v736_v43 = vld [vmem:[#allocation5 + $0x50] sm:$0xff] }
 0x194   : > { %2611 = vmatprep.subr.bf16.mxu1 %v2610_v41  ;;  %v2658_v45 = vpack.c.bf16 %v737_v44, %v736_v43  ;;  %v1137_v43 = vld [vmem:[#allocation5 + $0x200] sm:$0xff]  ;;  %v1138_v44 = vld [vmem:[#allocation5 + $0x208] sm:$0xff] }
 0x195   : > { %v3026_v47 = vpop.eup %3025 }
 0x196   : > { %703 = vmatmul.mubr.f32.gmra.mrb[2].mxu1 %v3026_v47  ;;  %v739_v47 = vld [vmem:[#allocation5 + $0x68] sm:$0xff] }
 0x197   : > { %2613 = vmatpush3.bf16.msra.mxu1 %v2610_v41  ;;  %v2778_v41 = vpack.c.bf16 %v1277_v38, %v1276_v37  ;;  %v1042_v37 = vld [vmem:[#allocation5 + $0x1e0] sm:$0xff]  ;;  %v1043_v38 = vld [vmem:[#allocation5 + $0x1e8] sm:$0xff] }
 0x198   : > { %2615 = vmatprep.subr.bf16.mxu1 %v2614_v46  ;;  %v2726_v39 = vpack.c.bf16 %v1043_v38, %v1042_v37 }
 0x199   : > { %2779 = vmatprep.subr.bf16.mxu0 %v2778_v41 }
 0x19a   : > { %2781 = vmatpush3.bf16.msra.mxu0 %v2778_v41  ;;  %v1045_v41 = vld [vmem:[#allocation5 + $0x1f8] sm:$0xff] }
 0x19b   : > { %2617 = vmatpush3.bf16.msra.mxu1 %v2614_v46  ;;  %v738_v46 = vld [vmem:[#allocation5 + $0x60] sm:$0xff] }
 0x19c   : > { %2619 = vmatprep.subr.bf16.mxu1 %v2618_v50  ;;  %v2662_v48 = vpack.c.bf16 %v739_v47, %v738_v46  ;;  %v2734_v46 = vpack.c.bf16 %v1138_v44, %v1137_v43  ;;  %v1139_v47 = vld [vmem:[#allocation5 + $0x210] sm:$0xff]  ;;  %v1251_v43 = vld [vmem:[#allocation7 + $0x20] sm:$0xff]  ;;  %v1252_v44 = vld [vmem:[#allocation7 + $0x28] sm:$0xff] }
 0x19f   : > { %2621 = vmatpush3.bf16.msra.mxu1 %v2618_v50  ;;  %v741_v50 = vld [vmem:[#allocation5 + $0x78] sm:$0xff] }
 0x1a0   : > { %2623 = vmatprep.subr.bf16.mxu1 %v2622_v53  ;;  %v2666_v51 = vpack.c.bf16 %v741_v50, %v740_v49 }
 0x1a3   : > { %2625 = vmatpush3.bf16.msra.mxu1 %v2622_v53  ;;  %v924_v53 = vld [vmem:[#allocation5 + $0x108] sm:$0xff] }
 0x1a4   : > { %2627 = vmatprep.subr.bf16.mxu1 %v2626_v56  ;;  %v2670_v54 = vpack.c.bf16 %v924_v53, %v923_v52  ;;  %v1141_v53 = vld [vmem:[#allocation5 + $0x220] sm:$0xff] }
 0x1a7   : > { %2629 = vmatpush3.bf16.msra.mxu1 %v2626_v56  ;;  %v926_v56 = vld [vmem:[#allocation5 + $0x118] sm:$0xff] }
 0x1a8   : > { %2631 = vmatprep.subr.bf16.mxu1 %v2630_v59  ;;  %v2674_v57 = vpack.c.bf16 %v926_v56, %v925_v55 }
 0x1ab   : > { %2633 = vmatpush3.bf16.msra.mxu1 %v2630_v59  ;;  %v927_v59 = vld [vmem:[#allocation5 + $0x120] sm:$0xff] }
 0x1ac   : > { %2635 = vmatprep.subr.bf16.mxu1 %v2634_v62  ;;  %v2678_v61 = vpack.c.bf16 %v928_v60, %v927_v59  ;;  %v1145_v60 = vld [vmem:[#allocation5 + $0x240] sm:$0xff] }
 0x1af   : > { %2637 = vmatpush3.bf16.msra.mxu1 %v2634_v62  ;;  %v929_v62 = vld [vmem:[#allocation5 + $0x130] sm:$0xff] }
 0x1b0   : > { %2639 = vmatprep.subr.bf16.mxu1 %v2638_v1  ;;  %v2682_v0 = vpack.c.bf16 %v930_v63, %v929_v62  ;;  %v1147_v63 = vld [vmem:[#allocation5 + $0x250] sm:$0xff] }
 0x265   : > { %v1974_v2 = vpop.f32.mrb[0].mxu1 }
 0x266   : > { %v1975_v4 = vpop.f32.mrb[1].mxu1 }
 0x267   : > { %v1976_v5 = vadd.f32 %v1975_v4, %v1974_v2  ;;  %v932_v2 = vld [vmem:[#allocation5 + $0x148] sm:$0xff]  ;;  %v933_v4 = vld [vmem:[#allocation5 + $0x150] sm:$0xff] }
 0x269   : > { %v3549_v6 = vadd.f32 %v1976_v5, %v1920_v3  ;;  %v1977_v7 = vpop.f32.mrb[2].mxu1  ;;  %v934_v5 = vld [vmem:[#allocation5 + $0x158] sm:$0xff] }
 0x26a   : > { %v1978_v8 = vpop.f32.mrb[3].mxu1 }
 0x26b   : > { %v1979_v9 = vadd.f32 %v1978_v8, %v1977_v7  ;;  %708 = vst [vmem:[%s3553_s29] sm:$0xff] %v3549_v6  ;;  %v742_v13 = vrot.slane %v3549_v6, 7  ;;  %v713_v18 = vrot.slane %v3549_v6, 6  ;;  %v2690_v7 = vpack.c.bf16 %v934_v5, %v933_v4  ;;  %v935_v8 = vld [vmem:[#allocation5 + $0x160] sm:$0xff]  ;;  %v1151_v5 = vld [vmem:[#allocation5 + $0x270] sm:$0xff] }
 0x26c   : > { %v1016_v21 = vrot.slane %v3549_v6, 1  ;;  %v1123_v50 = vrot.slane %v3549_v6, 2 }
 0x26d   : > { %v3557_v10 = vadd.f32 %v1979_v9, %v1920_v3  ;;  %v936_v9 = vld [vmem:[#allocation5 + $0x168] sm:$0xff] }
 0x26e   : > { %v2694_v11 = vpack.c.bf16 %v936_v9, %v935_v8 }
 0x26f   : > { %v743_v14 = vrot.slane %v3557_v10, 7  ;;  %v714_v15 = vrot.slane %v3557_v10, 6  ;;  %709 = vst [vmem:[%s3553_s29 + $0x8] sm:$0xff] %v3557_v10  ;;  %v1017_v20 = vrot.slane %v3557_v10, 1  ;;  %v1124_v49 = vrot.slane %v3557_v10, 2 }
 0x271   : > { %v746_v16 = vsel %vm744_vm0, %v743_v14, %v742_v13  ;;  %v745_v17 = vsel %vm744_vm0, %v742_v13, %v743_v14  ;;  %v717_v22 = vsel %vm715_vm2, %v714_v15, %v713_v18  ;;  %v716_v58 = vsel %vm715_vm2, %v713_v18, %v714_v15  ;;  %v938_v13 = vld [vmem:[#allocation5 + $0x178] sm:$0xff]  ;;  %v1030_v15 = vld [vmem:[#allocation5 + $0x180] sm:$0xff]  ;;  %v1032_v18 = vld [vmem:[#allocation5 + $0x190] sm:$0xff] }
 0x272   : > { %2192 = vmatprep.mubr.msk.f32.mxu1 %vm747_vm1, %v746_v16  ;;  %v2698_v14 = vpack.c.bf16 %v938_v13, %v937_v12  ;;  %v1031_v16 = vld [vmem:[#allocation5 + $0x188] sm:$0xff]  ;;  %v1019_v26 = vsel %vm1018_vm4, %v1016_v21, %v1017_v20  ;;  %v1020_v52 = vsel %vm1018_vm4, %v1017_v20, %v1016_v21  ;;  %v1126_v55 = vsel %vm1125_vm6, %v1123_v50, %v1124_v49  ;;  %v1284_v20 = vld [vmem:[#allocation7 + $0xf0] sm:$0xff]  ;;  %v1285_v21 = vld [vmem:[#allocation7 + $0xf8] sm:$0xff] }
 0x273   : > { %2193 = vmatmul.mubr.f32.vlgmr.msra.gmra.mrb[4].mxu1 %v745_v17  ;;  %v2702_v17 = vpack.c.bf16 %v1031_v16, %v1030_v15  ;;  %v1127_v9 = vsel %vm1125_vm6, %v1124_v49, %v1123_v50  ;;  %v1279_v12 = vld [vmem:[#allocation7 + $0xc8] sm:$0xff]  ;;  %v1281_v15 = vld [vmem:[#allocation7 + $0xd8] sm:$0xff] }
 0x274   : > { %2641 = vmatpush3.bf16.msra.mxu1 %v2638_v1  ;;  %2227 = vmatprep.mubr.msk.f32.mxu1 %vm718_vm3, %v717_v22  ;;  %v931_v1 = vld [vmem:[#allocation5 + $0x140] sm:$0xff]  ;;  %v1254_v49 = vld [vmem:[#allocation7 + $0x38] sm:$0xff] }
 0x275   : > { %2643 = vmatprep.subr.bf16.mxu1 %v2642_v19  ;;  %v2686_v3 = vpack.c.bf16 %v932_v2, %v931_v1  ;;  %v1149_v2 = vld [vmem:[#allocation5 + $0x260] sm:$0xff] }
 0x278   : > { %2645 = vmatpush3.bf16.msra.mxu1 %v2642_v19  ;;  %v1033_v19 = vld [vmem:[#allocation5 + $0x198] sm:$0xff] }
 0x279   : > { %2647 = vmatprep.subr.bf16.mxu1 %v2646_v29  ;;  %v2706_v22 = vpack.c.bf16 %v1033_v19, %v1032_v18  ;;  %v1283_v18 = vld [vmem:[#allocation7 + $0xe8] sm:$0xff] }
 0x27c   : > { %2649 = vmatpush3.bf16.msra.mxu1 %v2646_v29  ;;  %v1037_v29 = vld [vmem:[#allocation5 + $0x1b8] sm:$0xff] }
 0x27d   : > { %2651 = vmatprep.subr.bf16.mxu1 %v2650_v36  ;;  %v2714_v30 = vpack.c.bf16 %v1037_v29, %v1036_v28 }
 0x280   : > { %2653 = vmatpush3.bf16.msra.mxu1 %v2650_v36  ;;  %v2722_v36 = vpack.c.bf16 %v1041_v35, %v1040_v34  ;;  %v1249_v35 = vld [vmem:[#allocation7 + $0x10] sm:$0xff] }
 0x281   : > { %2655 = vmatprep.subr.bf16.mxu1 %v2654_v42 }
 0x284   : > { %2657 = vmatpush3.bf16.msra.mxu1 %v2654_v42  ;;  %v2730_v42 = vpack.c.bf16 %v1045_v41, %v1044_v40 }
 0x285   : > { %2659 = vmatprep.subr.bf16.mxu1 %v2658_v45 }
 0x288   : > { %2661 = vmatpush3.bf16.msra.mxu1 %v2658_v45  ;;  %v3597_v45 = vadd.s32 8, %v3535_v24 }
 0x289   : > { %2663 = vmatprep.subr.bf16.mxu1 %v2662_v48 }
 0x28a   : > { %vm1024_vm5 = vcmp.lt.s32.totalorder %v3597_v45, 15  ;;  %vm1131_vm7 = vcmp.lt.s32.totalorder %v3597_v45, 14 }
 0x28c   : > { %2665 = vmatpush3.bf16.msra.mxu1 %v2662_v48  ;;  %v1140_v48 = vld [vmem:[#allocation5 + $0x218] sm:$0xff] }
 0x28d   : > { %2667 = vmatprep.subr.bf16.mxu1 %v2666_v51 }
 0x290   : > { %2669 = vmatpush3.bf16.msra.mxu1 %v2666_v51  ;;  %v2738_v51 = vpack.c.bf16 %v1140_v48, %v1139_v47  ;;  %v2806_v47 = vpack.c.bf16 %v1252_v44, %v1251_v43  ;;  %v1253_v48 = vld [vmem:[#allocation7 + $0x30] sm:$0xff]  ;;  %v1545_v44 = vld [vmem:[#allocation7 + $0x1c0] sm:$0xff] }
 0x291   : > { %2671 = vmatprep.subr.bf16.mxu1 %v2670_v54  ;;  %v2810_v50 = vpack.c.bf16 %v1254_v49, %v1253_v48  ;;  %v1547_v48 = vld [vmem:[#allocation7 + $0x1d0] sm:$0xff]  ;;  %v1548_v49 = vld [vmem:[#allocation7 + $0x1d8] sm:$0xff] }
 0x293   : > { %2228 = vmatmul.mubr.f32.vlgmr.msra.gmra.mrb[4].mxu1 %v716_v58  ;;  %v1144_v58 = vld [vmem:[#allocation5 + $0x238] sm:$0xff] }
 0x294   : > { %2673 = vmatpush3.bf16.msra.mxu1 %v2670_v54  ;;  %2262 = vmatprep.mubr.f32.mxu1 %v3549_v6  ;;  %v1142_v54 = vld [vmem:[#allocation5 + $0x228] sm:$0xff] }
 0x295   : > { %2675 = vmatprep.subr.bf16.mxu1 %v2674_v57  ;;  %v2742_v56 = vpack.c.bf16 %v1142_v54, %v1141_v53  ;;  %v1257_v54 = vld [vmem:[#allocation7 + $0x50] sm:$0xff] }
 0x298   : > { %2677 = vmatpush3.bf16.msra.mxu1 %v2674_v57  ;;  %v1143_v57 = vld [vmem:[#allocation5 + $0x230] sm:$0xff] }
 0x299   : > { %2679 = vmatprep.subr.bf16.mxu1 %v2678_v61  ;;  %v2746_v59 = vpack.c.bf16 %v1144_v58, %v1143_v57  ;;  %v1259_v57 = vld [vmem:[#allocation7 + $0x60] sm:$0xff]  ;;  %v1260_v58 = vld [vmem:[#allocation7 + $0x68] sm:$0xff] }
 0x29c   : > { %2681 = vmatpush3.bf16.msra.mxu1 %v2678_v61  ;;  %v1146_v61 = vld [vmem:[#allocation5 + $0x248] sm:$0xff] }
 0x29d   : > { %2683 = vmatprep.subr.bf16.mxu1 %v2682_v0  ;;  %v2750_v62 = vpack.c.bf16 %v1146_v61, %v1145_v60  ;;  %v1261_v60 = vld [vmem:[#allocation7 + $0x70] sm:$0xff]  ;;  %v1262_v61 = vld [vmem:[#allocation7 + $0x78] sm:$0xff] }
 0x2a0   : > { %2685 = vmatpush3.bf16.msra.mxu1 %v2682_v0  ;;  %v1148_v0 = vld [vmem:[#allocation5 + $0x258] sm:$0xff] }
 0x2a1   : > { %2687 = vmatprep.subr.bf16.mxu1 %v2686_v3  ;;  %v2754_v1 = vpack.c.bf16 %v1148_v0, %v1147_v63  ;;  %v1437_v63 = vld [vmem:[#allocation7 + $0x100] sm:$0xff]  ;;  %v1438_v0 = vld [vmem:[#allocation7 + $0x108] sm:$0xff] }
 0x2a4   : > { %2689 = vmatpush3.bf16.msra.mxu1 %v2686_v3  ;;  %v1150_v3 = vld [vmem:[#allocation5 + $0x268] sm:$0xff] }
 0x2a5   : > { %2691 = vmatprep.subr.bf16.mxu1 %v2690_v7  ;;  %v2758_v4 = vpack.c.bf16 %v1150_v3, %v1149_v2  ;;  %v1439_v2 = vld [vmem:[#allocation7 + $0x110] sm:$0xff]  ;;  %v1440_v3 = vld [vmem:[#allocation7 + $0x118] sm:$0xff] }
 0x2a8   : > { %2693 = vmatpush3.bf16.msra.mxu1 %v2690_v7  ;;  %v1152_v7 = vld [vmem:[#allocation5 + $0x278] sm:$0xff] }
 0x2a9   : > { %2695 = vmatprep.subr.bf16.mxu1 %v2694_v11  ;;  %v2762_v8 = vpack.c.bf16 %v1152_v7, %v1151_v5  ;;  %v1441_v7 = vld [vmem:[#allocation7 + $0x120] sm:$0xff] }
 0x2ac   : > { %2697 = vmatpush3.bf16.msra.mxu1 %v2694_v11  ;;  %v1278_v11 = vld [vmem:[#allocation7 + $0xc0] sm:$0xff] }
 0x2ad   : > { %2699 = vmatprep.subr.bf16.mxu1 %v2698_v14  ;;  %v2782_v13 = vpack.c.bf16 %v1279_v12, %v1278_v11  ;;  %v1443_v11 = vld [vmem:[#allocation7 + $0x130] sm:$0xff]  ;;  %v1444_v12 = vld [vmem:[#allocation7 + $0x138] sm:$0xff] }
 0x2af   : > { %2783 = vmatprep.subr.bf16.mxu0 %v2782_v13 }
 0x2b0   : > { %2701 = vmatpush3.bf16.msra.mxu1 %v2698_v14  ;;  %2785 = vmatpush3.bf16.msra.mxu0 %v2782_v13  ;;  %v1280_v14 = vld [vmem:[#allocation7 + $0xd0] sm:$0xff]  ;;  %v2842_v13 = vpack.c.bf16 %v1444_v12, %v1443_v11 }
 0x2b1   : > { %2703 = vmatprep.subr.bf16.mxu1 %v2702_v17  ;;  %v2786_v16 = vpack.c.bf16 %v1281_v15, %v1280_v14  ;;  %v1445_v14 = vld [vmem:[#allocation7 + $0x140] sm:$0xff]  ;;  %v1446_v15 = vld [vmem:[#allocation7 + $0x148] sm:$0xff]  ;;  %v1647_v12 = vld [vmem:[#allocation7 + $0x250] sm:$0xff] }
 0x2b3   : > { %2263 = vmatmul.mubr.f32.vlgmr.msra.gmra.mrb[4].mxu1 %v3557_v10  ;;  %2787 = vmatprep.subr.bf16.mxu0 %v2786_v16 }
 0x2b4   : > { %2705 = vmatpush3.bf16.msra.mxu1 %v2702_v17  ;;  %2297 = vmatprep.mubr.f32.mxu1 %v1019_v26  ;;  %v1282_v17 = vld [vmem:[#allocation7 + $0xe0] sm:$0xff]  ;;  %v2798_v26 = vpack.c.bf16 %v1248_v25, %v1247_v23  ;;  %v1451_v23 = vld [vmem:[#allocation7 + $0x170] sm:$0xff]  ;;  %v1452_v25 = vld [vmem:[#allocation7 + $0x178] sm:$0xff] }
 0x2b5   : > { %2707 = vmatprep.subr.bf16.mxu1 %v2706_v22  ;;  %v2790_v19 = vpack.c.bf16 %v1283_v18, %v1282_v17  ;;  %2789 = vmatpush3.bf16.msra.mxu0 %v2786_v16  ;;  %v2846_v16 = vpack.c.bf16 %v1446_v15, %v1445_v14  ;;  %v1447_v17 = vld [vmem:[#allocation7 + $0x150] sm:$0xff]  ;;  %v1448_v18 = vld [vmem:[#allocation7 + $0x158] sm:$0xff]  ;;  %v1649_v15 = vld [vmem:[#allocation7 + $0x260] sm:$0xff] }
 0x2b7   : > { %2791 = vmatprep.subr.bf16.mxu0 %v2790_v19 }
 0x2b8   : > { %2709 = vmatpush3.bf16.msra.mxu1 %v2706_v22  ;;  %v2794_v22 = vpack.c.bf16 %v1285_v21, %v1284_v20  ;;  %v1449_v20 = vld [vmem:[#allocation7 + $0x160] sm:$0xff]  ;;  %v1450_v21 = vld [vmem:[#allocation7 + $0x168] sm:$0xff] }
 0x2b9   : > { %2711 = vmatprep.subr.bf16.mxu1 %v2710_v27  ;;  %2793 = vmatpush3.bf16.msra.mxu0 %v2790_v19  ;;  %v2850_v19 = vpack.c.bf16 %v1448_v18, %v1447_v17  ;;  %v1651_v18 = vld [vmem:[#allocation7 + $0x270] sm:$0xff] }
 0x2ba   : > { %2795 = vmatprep.subr.bf16.mxu0 %v2794_v22 }
 0x2bc   : > { %2713 = vmatpush3.bf16.msra.mxu1 %v2710_v27  ;;  %v1925_v27 = vld [vmem:[%s3759_s6] ss:$0 sm:$0xff] }
 0x2bd   : > { %2715 = vmatprep.subr.bf16.mxu1 %v2714_v30  ;;  %2797 = vmatpush3.bf16.msra.mxu0 %v2794_v22  ;;  %v2854_v22 = vpack.c.bf16 %v1450_v21, %v1449_v20 }
 0x2be   : > { %2799 = vmatprep.subr.bf16.mxu0 %v2798_v26 }
 0x2c0   : > { %2717 = vmatpush3.bf16.msra.mxu1 %v2714_v30 }
 0x2c1   : > { %2719 = vmatprep.subr.bf16.mxu1 %v2718_v33 }
 0x2c4   : > { %2721 = vmatpush3.bf16.msra.mxu1 %v2718_v33 }
 0x2c5   : > { %2723 = vmatprep.subr.bf16.mxu1 %v2722_v36 }
 0x2c8   : > { %2725 = vmatpush3.bf16.msra.mxu1 %v2722_v36  ;;  %v1250_v36 = vld [vmem:[#allocation7 + $0x18] sm:$0xff] }
 0x2c9   : > { %2727 = vmatprep.subr.bf16.mxu1 %v2726_v39 }
 0x2cc   : > { %2729 = vmatpush3.bf16.msra.mxu1 %v2726_v39 }
 0x2cd   : > { %2731 = vmatprep.subr.bf16.mxu1 %v2730_v42 }
 0x2d0   : > { %2733 = vmatpush3.bf16.msra.mxu1 %v2730_v42  ;;  %v2802_v42 = vpack.c.bf16 %v1250_v36, %v1249_v35 }
 0x2d1   : > { %2735 = vmatprep.subr.bf16.mxu1 %v2734_v46 }
 0x2d3   : > { %2298 = vmatmul.mubr.msk.f32.vlgmr.msra.gmra.mrb[4].mxu1 %vm1024_vm5, %v1020_v52  ;;  %v1256_v52 = vld [vmem:[#allocation7 + $0x48] sm:$0xff] }
 0x2d4   : > { %2737 = vmatpush3.bf16.msra.mxu1 %v2734_v46  ;;  %2332 = vmatprep.mubr.f32.mxu1 %v1126_v55  ;;  %v1258_v55 = vld [vmem:[#allocation7 + $0x58] sm:$0xff] }
 0x2d5   : > { %2739 = vmatprep.subr.bf16.mxu1 %v2738_v51 }
 0x2d8   : > { %2741 = vmatpush3.bf16.msra.mxu1 %v2738_v51  ;;  %v1255_v51 = vld [vmem:[#allocation7 + $0x40] sm:$0xff] }
 0x2d9   : > { %2743 = vmatprep.subr.bf16.mxu1 %v2742_v56  ;;  %v2814_v53 = vpack.c.bf16 %v1256_v52, %v1255_v51  ;;  %v1549_v51 = vld [vmem:[#allocation7 + $0x1e0] sm:$0xff]  ;;  %v1550_v52 = vld [vmem:[#allocation7 + $0x1e8] sm:$0xff] }
 0x2dc   : > { %2745 = vmatpush3.bf16.msra.mxu1 %v2742_v56  ;;  %v2818_v56 = vpack.c.bf16 %v1258_v55, %v1257_v54  ;;  %v1551_v54 = vld [vmem:[#allocation7 + $0x1f0] sm:$0xff]  ;;  %v1552_v55 = vld [vmem:[#allocation7 + $0x1f8] sm:$0xff] }
 0x2dd   : > { %2747 = vmatprep.subr.bf16.mxu1 %v2746_v59 }
 0x2e0   : > { %2749 = vmatpush3.bf16.msra.mxu1 %v2746_v59  ;;  %v2822_v59 = vpack.c.bf16 %v1260_v58, %v1259_v57  ;;  %v1637_v57 = vld [vmem:[#allocation7 + $0x200] sm:$0xff]  ;;  %v1638_v58 = vld [vmem:[#allocation7 + $0x208] sm:$0xff] }
 0x2e1   : > { %2751 = vmatprep.subr.bf16.mxu1 %v2750_v62 }
 0x2e4   : > { %2753 = vmatpush3.bf16.msra.mxu1 %v2750_v62  ;;  %v2826_v62 = vpack.c.bf16 %v1262_v61, %v1261_v60  ;;  %v1639_v60 = vld [vmem:[#allocation7 + $0x210] sm:$0xff]  ;;  %v1640_v61 = vld [vmem:[#allocation7 + $0x218] sm:$0xff] }
 0x2e5   : > { %2755 = vmatprep.subr.bf16.mxu1 %v2754_v1 }
 0x2e8   : > { %2757 = vmatpush3.bf16.msra.mxu1 %v2754_v1  ;;  %v2830_v1 = vpack.c.bf16 %v1438_v0, %v1437_v63  ;;  %v2898_v0 = vpack.c.bf16 %v1640_v61, %v1639_v60 }
 0x2e9   : > { %2759 = vmatprep.subr.bf16.mxu1 %v2758_v4 }
 0x2ec   : > { %2761 = vmatpush3.bf16.msra.mxu1 %v2758_v4  ;;  %v2834_v4 = vpack.c.bf16 %v1440_v3, %v1439_v2  ;;  %v1641_v2 = vld [vmem:[#allocation7 + $0x220] sm:$0xff]  ;;  %v1642_v3 = vld [vmem:[#allocation7 + $0x228] sm:$0xff] }
 0x2ed   : > { %2763 = vmatprep.subr.bf16.mxu1 %v2762_v8 }
 0x2f0   : > { %2765 = vmatpush3.bf16.msra.mxu1 %v2762_v8  ;;  %v1442_v8 = vld [vmem:[#allocation7 + $0x128] sm:$0xff] }
 0x2f3   : > { %2333 = vmatmul.mubr.msk.f32.vlgmr.msra.gmra.mrb[4].mxu1 %vm1131_vm7, %v1127_v9  ;;  %v2838_v9 = vpack.c.bf16 %v1442_v8, %v1441_v7  ;;  %v1645_v8 = vld [vmem:[#allocation7 + $0x240] sm:$0xff] }
 0x3c6   : > { %v2334_v28 = vpop.f32.mrb[4].mxu1 }
 0x3c7   : > { %v1238_v29 = vadd.f32 %v2334_v28, %v1925_v27  ;;  %v1219_v30 = vpop.f32.mrb[5].mxu1  ;;  %v1538_v28 = vld [vmem:[#allocation7 + $0x188] sm:$0xff] }
 0x3c8   : > { %v1237_v31 = vadd.f32 %v1925_v27, %v1219_v30  ;;  %v1537_v27 = vld [vmem:[#allocation7 + $0x180] sm:$0xff]  ;;  %v1539_v30 = vld [vmem:[#allocation7 + $0x190] sm:$0xff] }
 0x3c9   : > { %3027 = vtanh.f32 %v1238_v29  ;;  %v2862_v29 = vpack.c.bf16 %v1538_v28, %v1537_v27 }
 0x3ca   : > { %3029 = vtanh.f32 %v1237_v31  ;;  %v1540_v31 = vld [vmem:[#allocation7 + $0x198] sm:$0xff] }
 0x3cb   : > { %v2866_v36 = vpack.c.bf16 %v1540_v31, %v1539_v30 }
 0x3d3   : > { %v3617_v32 = vpop.eup %3027 }
 0x3d4   : > { %v3619_v33 = vpop.eup %3029  ;;  %v1264_v34 = vrot.slane %v3617_v32, 7  ;;  %v1242_v39 = vrot.slane %v3617_v32, 6  ;;  %v1531_v35 = vrot.slane %v3617_v32, 1  ;;  %v1631_v63 = vrot.slane %v3617_v32, 2 }
 0x3d5   : > { %v1263_v37 = vrot.slane %v3619_v33, 7  ;;  %v1241_v38 = vrot.slane %v3619_v33, 6 }
 0x3d7   : > { %v1266_v40 = vsel %vm744_vm0, %v1264_v34, %v1263_v37  ;;  %v1265_v41 = vsel %vm744_vm0, %v1263_v37, %v1264_v34  ;;  %v1244_v46 = vsel %vm715_vm2, %v1242_v39, %v1241_v38  ;;  %v1243_v5 = vsel %vm715_vm2, %v1241_v38, %v1242_v39  ;;  %v1541_v37 = vld [vmem:[#allocation7 + $0x1a0] sm:$0xff]  ;;  %v1542_v38 = vld [vmem:[#allocation7 + $0x1a8] sm:$0xff] }
 0x3d8   : > { %2367 = vmatprep.mubr.msk.f32.mxu0 %vm747_vm1, %v1266_v40  ;;  %v1530_v34 = vrot.slane %v3619_v33, 1  ;;  %v2870_v40 = vpack.c.bf16 %v1542_v38, %v1541_v37 }
 0x3d9   : > { %2368 = vmatmul.mubr.f32.vlgmr.msra.gmra.mrb[4].mxu0 %v1265_v41  ;;  %v1543_v41 = vld [vmem:[#allocation7 + $0x1b0] sm:$0xff] }
 0x3da   : > { %2801 = vmatpush3.bf16.msra.mxu0 %v2798_v26  ;;  %2402 = vmatprep.mubr.msk.f32.mxu0 %vm718_vm3, %v1244_v46  ;;  %v2858_v26 = vpack.c.bf16 %v1452_v25, %v1451_v23  ;;  %v1532_v39 = vsel %vm1018_vm4, %v1530_v34, %v1531_v35  ;;  %v1546_v46 = vld [vmem:[#allocation7 + $0x1c8] sm:$0xff] }
 0x3db   : > { %2803 = vmatprep.subr.bf16.mxu0 %v2802_v42 }
 0x3de   : > { %2805 = vmatpush3.bf16.msra.mxu0 %v2802_v42  ;;  %v1544_v42 = vld [vmem:[#allocation7 + $0x1b8] sm:$0xff] }
 0x3df   : > { %2807 = vmatprep.subr.bf16.mxu0 %v2806_v47  ;;  %v2874_v43 = vpack.c.bf16 %v1544_v42, %v1543_v41 }
 0x3e2   : > { %2809 = vmatpush3.bf16.msra.mxu0 %v2806_v47  ;;  %v2878_v47 = vpack.c.bf16 %v1546_v46, %v1545_v44 }
 0x3e3   : > { %2811 = vmatprep.subr.bf16.mxu0 %v2810_v50 }
 0x3e6   : > { %2813 = vmatpush3.bf16.msra.mxu0 %v2810_v50  ;;  %v2882_v50 = vpack.c.bf16 %v1548_v49, %v1547_v48 }
 0x3e7   : > { %2815 = vmatprep.subr.bf16.mxu0 %v2814_v53 }
 0x3ea   : > { %2817 = vmatpush3.bf16.msra.mxu0 %v2814_v53  ;;  %v2886_v53 = vpack.c.bf16 %v1550_v52, %v1549_v51 }
 0x3eb   : > { %2819 = vmatprep.subr.bf16.mxu0 %v2818_v56 }
 0x3ee   : > { %2821 = vmatpush3.bf16.msra.mxu0 %v2818_v56  ;;  %v2890_v56 = vpack.c.bf16 %v1552_v55, %v1551_v54 }
 0x3ef   : > { %2823 = vmatprep.subr.bf16.mxu0 %v2822_v59 }
 0x3f2   : > { %2825 = vmatpush3.bf16.msra.mxu0 %v2822_v59  ;;  %v2894_v59 = vpack.c.bf16 %v1638_v58, %v1637_v57 }
 0x3f3   : > { %2827 = vmatprep.subr.bf16.mxu0 %v2826_v62 }
 0x3f6   : > { %2829 = vmatpush3.bf16.msra.mxu0 %v2826_v62  ;;  %v1630_v62 = vrot.slane %v3619_v33, 2 }
 0x3f7   : > { %2831 = vmatprep.subr.bf16.mxu0 %v2830_v1 }
 0x3f8   : > { %v1633_v21 = vsel %vm1125_vm6, %v1631_v63, %v1630_v62 }
 0x3f9   : > { %2403 = vmatmul.mubr.f32.vlgmr.msra.gmra.mrb[4].mxu0 %v1243_v5  ;;  %v1643_v5 = vld [vmem:[#allocation7 + $0x230] sm:$0xff] }
 0x3fa   : > { %2833 = vmatpush3.bf16.msra.mxu0 %v2830_v1  ;;  %2437 = vmatprep.mubr.f32.mxu0 %v3619_v33  ;;  %v1533_v1 = vsel %vm1018_vm4, %v1531_v35, %v1530_v34  ;;  %v2902_v33 = vpack.c.bf16 %v1642_v3, %v1641_v2 }
 0x3fb   : > { %2835 = vmatprep.subr.bf16.mxu0 %v2834_v4 }
 0x3fe   : > { %2837 = vmatpush3.bf16.msra.mxu0 %v2834_v4  ;;  %v1632_v4 = vsel %vm1125_vm6, %v1630_v62, %v1631_v63 }
 0x3ff   : > { %2839 = vmatprep.subr.bf16.mxu0 %v2838_v9 }
 0x402   : > { %2841 = vmatpush3.bf16.msra.mxu0 %v2838_v9  ;;  %v1646_v9 = vld [vmem:[#allocation7 + $0x248] sm:$0xff] }
 0x403   : > { %2843 = vmatprep.subr.bf16.mxu0 %v2842_v13  ;;  %v2910_v11 = vpack.c.bf16 %v1646_v9, %v1645_v8 }
 0x406   : > { %2845 = vmatpush3.bf16.msra.mxu0 %v2842_v13  ;;  %v1648_v13 = vld [vmem:[#allocation7 + $0x258] sm:$0xff] }
 0x407   : > { %2847 = vmatprep.subr.bf16.mxu0 %v2846_v16  ;;  %v2914_v14 = vpack.c.bf16 %v1648_v13, %v1647_v12 }
 0x40a   : > { %2849 = vmatpush3.bf16.msra.mxu0 %v2846_v16  ;;  %v1650_v16 = vld [vmem:[#allocation7 + $0x268] sm:$0xff] }
 0x40b   : > { %2851 = vmatprep.subr.bf16.mxu0 %v2850_v19  ;;  %v2918_v17 = vpack.c.bf16 %v1650_v16, %v1649_v15 }
 0x40e   : > { %2853 = vmatpush3.bf16.msra.mxu0 %v2850_v19  ;;  %v1652_v19 = vld [vmem:[#allocation7 + $0x278] sm:$0xff] }
 0x40f   : > { %2855 = vmatprep.subr.bf16.mxu0 %v2854_v22  ;;  %v2922_v20 = vpack.c.bf16 %v1652_v19, %v1651_v18 }
 0x412   : > { %2857 = vmatpush3.bf16.msra.mxu0 %v2854_v22 }
 0x413   : > { %2859 = vmatprep.subr.bf16.mxu0 %v2858_v26 }
 0x416   : > { %2861 = vmatpush3.bf16.msra.mxu0 %v2858_v26 }
 0x417   : > { %2863 = vmatprep.subr.bf16.mxu0 %v2862_v29 }
 0x419   : > { %2438 = vmatmul.mubr.f32.vlgmr.msra.gmra.mrb[4].mxu0 %v3617_v32  ;;  %v1644_v32 = vld [vmem:[#allocation7 + $0x238] sm:$0xff] }
 0x41a   : > { %2865 = vmatpush3.bf16.msra.mxu0 %v2862_v29  ;;  %2472 = vmatprep.mubr.f32.mxu0 %v1532_v39  ;;  %v2906_v7 = vpack.c.bf16 %v1644_v32, %v1643_v5 }
 0x41b   : > { %2867 = vmatprep.subr.bf16.mxu0 %v2866_v36 }
 0x41e   : > { %2869 = vmatpush3.bf16.msra.mxu0 %v2866_v36 }
 0x41f   : > { %2871 = vmatprep.subr.bf16.mxu0 %v2870_v40 }
 0x422   : > { %2873 = vmatpush3.bf16.msra.mxu0 %v2870_v40 }
 0x423   : > { %2875 = vmatprep.subr.bf16.mxu0 %v2874_v43 }
 0x426   : > { %2877 = vmatpush3.bf16.msra.mxu0 %v2874_v43 }
 0x427   : > { %2879 = vmatprep.subr.bf16.mxu0 %v2878_v47 }
 0x42a   : > { %2881 = vmatpush3.bf16.msra.mxu0 %v2878_v47 }
 0x42b   : > { %2883 = vmatprep.subr.bf16.mxu0 %v2882_v50 }
 0x42e   : > { %2885 = vmatpush3.bf16.msra.mxu0 %v2882_v50 }
 0x42f   : > { %2887 = vmatprep.subr.bf16.mxu0 %v2886_v53 }
 0x432   : > { %2889 = vmatpush3.bf16.msra.mxu0 %v2886_v53 }
 0x433   : > { %2891 = vmatprep.subr.bf16.mxu0 %v2890_v56 }
 0x436   : > { %2893 = vmatpush3.bf16.msra.mxu0 %v2890_v56 }
 0x437   : > { %2895 = vmatprep.subr.bf16.mxu0 %v2894_v59 }
 0x439   : > { %2473 = vmatmul.mubr.msk.f32.vlgmr.msra.gmra.mrb[4].mxu0 %vm1024_vm5, %v1533_v1 }
 0x43a   : > { %2897 = vmatpush3.bf16.msra.mxu0 %v2894_v59  ;;  %2507 = vmatprep.mubr.f32.mxu0 %v1632_v4 }
 0x43b   : > { %2899 = vmatprep.subr.bf16.mxu0 %v2898_v0 }
 0x43e   : > { %2901 = vmatpush3.bf16.msra.mxu0 %v2898_v0 }
 0x43f   : > { %2903 = vmatprep.subr.bf16.mxu0 %v2902_v33 }
 0x442   : > { %2905 = vmatpush3.bf16.msra.mxu0 %v2902_v33 }
 0x443   : > { %2907 = vmatprep.subr.bf16.mxu0 %v2906_v7 }
 0x446   : > { %2909 = vmatpush3.bf16.msra.mxu0 %v2906_v7 }
 0x447   : > { %2911 = vmatprep.subr.bf16.mxu0 %v2910_v11 }
 0x44a   : > { %2913 = vmatpush3.bf16.msra.mxu0 %v2910_v11 }
 0x44b   : > { %2915 = vmatprep.subr.bf16.mxu0 %v2914_v14 }
 0x44e   : > { %2917 = vmatpush3.bf16.msra.mxu0 %v2914_v14 }
 0x44f   : > { %2919 = vmatprep.subr.bf16.mxu0 %v2918_v17 }
 0x452   : > { %2921 = vmatpush3.bf16.msra.mxu0 %v2918_v17 }
 0x453   : > { %2923 = vmatprep.subr.bf16.mxu0 %v2922_v20 }
 0x456   : > { %2925 = vmatpush3.bf16.msra.mxu0 %v2922_v20 }
 0x459   : > { %2508 = vmatmul.mubr.msk.f32.vlgmr.msra.gmra.mrb[4].mxu0 %vm1131_vm7, %v1633_v21 }
 0x45a   : > { %3128 = shalt.err (!%p3125_p11)
}
 0x45b   : > { %s3129_s18 = scalar_lea.hbm %s3661_s5, 256  ;;  %s3133_s11 = scalar_lea.hbm %s3762_s9, 512 }
 0x45c   : > { %p3130_p5 = scmp.ne.s32.totalorder %s3661_s5, %s3129_s18  ;;  %p3134_p9 = scmp.lt.u32.totalorder %s3661_s5, %s3762_s9 }
 0x45d   : > { %p3135_p10 = scmp.lt.u32.totalorder %s3133_s11, %s3129_s18  ;;  %p3137_p13 = scmp.lt.u32.totalorder %s3129_s18, %s3661_s5 }
 0x45e   : > { %p3131_p0 = pnand %p3130_p5, %p3793_p1 }
 0x45f   : > { %p3136_p12 = por %p3135_p10, %p3134_p9 }
 0x460   : > { %p3132_p6 = pneg %p3131_p0 }
 0x461   : > { %p3138_p2 = por %p3137_p13, %p3136_p12 }
 0x463   : > { %p3139_p3 = pnand %p3138_p2, %p3132_p6 }
 0x465   : > { %3142 = shalt.err (!%p3139_p3)
}
 0x466   : > { %s3227_s19 = smov 128   ;;  %s3228_s28 = smov 8   ;;  %v1930_v24 = vld [vmem:[%s3761_s8] ss:$0 sm:$0xff] }
 0x467   : > { %2954 = dma.vmem_to_hbm [thread:$0]  (%p3793_p1), %s3664_s20, 256, %s3661_s5, %s1746_s25, %s3227_s19, %s3227_s19, %s3228_s28  }
 0x468   : > { %s410_s15 = scalar_lea.vmem [#allocation9], %s1915_s22  ;;  %s3707_s25 = scalar_lea.hbm %s3763_s10, %s1940_s30 }
 0x469   : > { %s1780_s18 = sshll.u32 %s410_s15, 4  ;;  %s1751_s22 = scalar_lea.sflag [#allocation10], %s3543_s24  ;;  %s3699_s18 = int_to_ptr.vmem [resolvable:$true] %s1780_s18 }
 0x46a   : > { %s3143_s21 = scalar_lea.vmem %s3699_s18, 256  ;;  %s3229_s29 = smov [#allocation9]  }
 0x46b   : > { %p3144_p4 = scmp.ne.s32.totalorder %s3699_s18, %s3143_s21  ;;  %s3147_s11 = sshll.u32 %s3229_s29, 4  ;;  %s3148_s11 = int_to_ptr.vmem [resolvable:$false] %s3147_s11 }
 0x46c   : > { %s3149_s27 = scalar_lea.vmem %s3148_s11, 512  ;;  %p3150_p11 = scmp.lt.s32.totalorder %s3699_s18, %s3148_s11 }
 0x46d   : > { %p3145_p7 = pnand %p3144_p4, %p3793_p1  ;;  %p3151_p5 = scmp.lt.s32.totalorder %s3149_s27, %s3143_s21 }
 0x46f   : > { %p3146_p8 = pneg %p3145_p7  ;;  %p3152_p0 = por %p3151_p5, %p3150_p11 }
 0x471   : > { %p3153_p6 = pnand %p3152_p0, %p3146_p8 }
 0x52c   : > { %v2509_v45 = vpop.f32.mrb[4].mxu0 }
 0x52d   : > { %v1738_v22 = vadd.f32 %v2509_v45, %v1930_v24  ;;  %v1719_v23 = vpop.f32.mrb[5].mxu0 }
 0x52e   : > { %v1737_v25 = vadd.f32 %v1930_v24, %v1719_v23 }
 0x52f   : > { %v1742_v26 = vadd.f32 %v1738_v22, %v3557_v10 }
 0x530   : > { %v1741_v27 = vadd.f32 %v1737_v25, %v3549_v6 }
 0x531   : > { %1744 = vst [vmem:[%s410_s15 + $0x8] sm:$0xff] %v1742_v26 }
 0x532   : > { %1743 = vst [vmem:[%s410_s15] sm:$0xff] %v1741_v27 }
 0x533   : > { %3156 = shalt.err (!%p3153_p6)
}
 0x534   : > { %s3157_s17 = scalar_lea.hbm %s3707_s25, 256  ;;  %s3161_s26 = scalar_lea.hbm %s3763_s10, 512 }
 0x535   : > { %p3158_p9 = scmp.ne.s32.totalorder %s3707_s25, %s3157_s17  ;;  %p3162_p13 = scmp.lt.u32.totalorder %s3707_s25, %s3763_s10 }
 0x536   : > { %p3163_p2 = scmp.lt.u32.totalorder %s3161_s26, %s3157_s17  ;;  %p3165_p4 = scmp.lt.u32.totalorder %s3157_s17, %s3707_s25 }
 0x537   : > { %p3159_p10 = pnand %p3158_p9, %p3793_p1 }
 0x538   : > { %p3164_p3 = por %p3163_p2, %p3162_p13 }
 0x539   : > { %p3160_p12 = pneg %p3159_p10 }
 0x53a   : > { %p3166_p7 = por %p3165_p4, %p3164_p3 }
 0x53c   : > { %p3167_p8 = pnand %p3166_p7, %p3160_p12 }
 0x53e   : > { %3170 = shalt.err (!%p3167_p8)
}
 0x53f   : > { %2955 = dma.vmem_to_hbm [thread:$0]  (%p3793_p1), %s3699_s18, 256, %s3707_s25, %s1751_s22, %s3227_s19, %s3227_s19, %s3228_s28  }
 0x540 PF: > { %s3794_s5 = sld [smem:[#allocation15_spill]]  ;;  %s3795_s20 = sld [smem:[#allocation19_spill]] }
 0x541   : > { %p2981_p11 = scmp.ge.s32.totalorder %s3217_s16, 2 }
 0x546   : > { %s1795_s21 = sand.u32 1, %s3794_s5   ;;  %p3796_p5 = scmp.ne.s32.totalorder %s3795_s20, 0 }
 0x547   : > { %s1796_s29 = scalar_lea.sflag [#allocation4], %s1795_s21 }
 0x548   : > { %p2969_p0 = pnand %p2981_p11, %p3796_p5 }
 0x54a   : > { %3196 = dma.done.wait (!%p2969_p0), %s1796_s29, 256  }
 0x54b   : > { %3198 = vsyncadd (!%p2969_p0), %s1796_s29, 4294967040  ;;  %s1805_s23 = scalar_lea.sflag [#allocation10], %s1795_s21 }
 0x54c   : > { %3200 = dma.done.wait (!%p2969_p0), %s1805_s23, 256  }
 0x54d   : > { %3202 = vsyncadd (!%p2969_p0), %s1805_s23, 4294967040  ;;  %s3797_s16 = sld [smem:[#allocation17_spill]]  ;;  %s3798_s24 = sld [smem:[#allocation16_spill]] }
 0x54e   : > { %s3799_s15 = sld [smem:[#allocation18_spill]]  ;;  %s3800_s13 = smov %s3209_s14 }
 0x553   : > { %p26_p1 = scmp.ge.s32.totalorder %s3797_s16, 4   ;;  %s3801_s14 = smov %s3798_s24 }
 0x555   :  { %28 = sbr.rel (!%p26_p1) target bundleno = 9 (0x9), region = 129 }
 0x55c   :  { %1810 = vsyncpa [#allocation3], 1 }
 0x55d   :  { %1812 = vsyncpa [#allocation3 + $0x1], 1 }
 0x55e   :  { %1813 = vsyncpa [#allocation6], 1 }
 0x55f   :  { %1814 = vsyncpa [#allocation4], 1 }
 0x560   :  { %1816 = vsyncpa [#allocation4 + $0x1], 1 }
 0x561   :  { %1817 = vsyncpa [#allocation10], 1 }
 0x562   :  { %1819 = vsyncpa [#allocation10 + $0x1], 1 }

</bundles_post_ra>
